<compile_context>
chip_gen: v6e
topology: v6e:2x2x1
jax: 0.10.0
libtpu: 0.0.40
codegen_flags: <defaults>
</compile_context>

<pallas_src>
import numpy as np
import jax
import jax.numpy as jnp
from jax.experimental import pallas as pl
from jax.experimental.pallas import tpu as pltpu

LANE = 128     # lane width: hidden size padded to a multiple of this
SUBLANE = 8    # f32 sublane count: batch padded to a multiple of this


def _round_up(x, m):
    return ((x + m - 1) // m) * m


def lstm_chunk_kernel(xw_ref, len_ref, whh_ref, out_ref, h_scr, c_scr):
    """Grid = (batch_blocks, time_chunks); one grid step = one (BB, TT) tile.

    xw_ref : (TT, BB, 4H)  precomputed x @ W_ih^T + (b_ih + b_hh), time-major
    len_ref: (BB, 1)       int32 per-sequence lengths
    whh_ref: (H, 4H)       recurrent weight, transposed (MXU dtype)
    out_ref: (TT, BB, H)   LSTM hidden states (zeroed at padded positions)
    h_scr/c_scr: (BB, H)   f32 recurrent state, carried across time chunks
    """
    chunk = pl.program_id(1)
    TT = xw_ref.shape[0]
    H = h_scr.shape[-1]

    @pl.when(chunk == 0)
    def _():
        h_scr[...] = jnp.zeros_like(h_scr)
        c_scr[...] = jnp.zeros_like(c_scr)

    lens = len_ref[...]                 # (BB, 1) int32
    t0 = chunk * TT                     # global timestep offset of this chunk

    def step(t, carry):
        h, c = carry                    # f32 (BB, H) in vregs — no VMEM round trip

        # Single MXU push per timestep; input projection + bias already folded
        # into xw_ref outside the serial loop.  Only the matmul operands are
        # in the (possibly bf16) MXU dtype; accumulation and gate math are f32.
        gates = xw_ref[t].astype(jnp.float32) + jnp.dot(
            h.astype(whh_ref.dtype), whh_ref[...],
            preferred_element_type=jnp.float32)                  # (BB, 4H)

        # PyTorch LSTM gate layout [i, f, g, o]; H == 128 -> each slice is a
        # whole-vreg, lane-aligned block (no masked / shuffled accesses).
        i_g = jax.nn.sigmoid(gates[:, 0 * H:1 * H])
        f_g = jax.nn.sigmoid(gates[:, 1 * H:2 * H])
        g_g = jnp.tanh(gates[:, 2 * H:3 * H])
        o_g = jax.nn.sigmoid(gates[:, 3 * H:4 * H])

        c_new = f_g * c + i_g * g_g
        h_new = o_g * jnp.tanh(c_new)

        # packed-sequence semantics: freeze state and emit zeros at t >= length.
        valid = (t0 + t) < lens                                   # (BB, 1)
        h = jnp.where(valid, h_new, h)
        c = jnp.where(valid, c_new, c)
        out_ref[t] = jnp.where(valid, h_new, 0.0)                 # lane-dense vst
        return (h, c)

    h_fin, c_fin = jax.lax.fori_loop(
        0, TT, step, (h_scr[...], c_scr[...]), unroll=4)
    h_scr[...] = h_fin
    c_scr[...] = c_fin


def world_model_forward(states, actions, lengths, params, *,
                        tt=8, b_block=8, mxu_dtype=jnp.bfloat16):
    """Batch-first (B, T, S)/(B, T, A) inputs -> (next_state, reward, done)."""
    B, T, S = states.shape
    A = actions.shape[-1]
    D = S + A
    H = params["w_hh"].shape[1]
    Hp = _round_up(H, LANE)

    # pad_packed_sequence returns tensors of length max(length); also avoids
    # running dead timesteps.  NOTE: lengths are concretized on host (same as
    # pack_padded_sequence); keep them static if wrapping this in jit.
    lengths_np = np.asarray(lengths)
    t_max = int(lengths_np.max())

    b_block = _round_up(min(b_block, _round_up(B, SUBLANE)), SUBLANE)
    Bp = _round_up(B, b_block)
    n_bb = Bp // b_block

    # ---- parameter padding (exact): pad each of the 4 gate blocks from H to
    # Hp with zeros; padded gate pre-activations are 0, so padded hidden/cell
    # channels stay identically 0 and never feed back into real channels.
    def pad_gate_rows(w):                                # (4H, K) -> (4Hp, K)
        K = w.shape[-1]
        return jnp.pad(w.reshape(4, H, K),
                       ((0, 0), (0, Hp - H), (0, 0))).reshape(4 * Hp, K)

    w_ih_p = pad_gate_rows(params["w_ih"].astype(jnp.float32))           # (4Hp, D)
    w_hh_p = jnp.pad(params["w_hh"].astype(jnp.float32).reshape(4, H, H),
                     ((0, 0), (0, Hp - H), (0, Hp - H))).reshape(4 * Hp, Hp)
    bias_p = jnp.pad((params["b_ih"] + params["b_hh"]).astype(jnp.float32)
                     .reshape(4, H), ((0, 0), (0, Hp - H))).reshape(4 * Hp)

    # ---- batch padding: padded rows get length 0 -> fully masked in-kernel.
    x = jnp.concatenate([states, actions], axis=-1)[:, :t_max].astype(jnp.float32)
    x = jnp.pad(x, ((0, Bp - B), (0, 0), (0, 0)))                        # (Bp, Tm, D)
    len_arr = jnp.pad(jnp.asarray(lengths, jnp.int32),
                      (0, Bp - B)).reshape(Bp, 1)

    # ---- Hoisted input projection: one big lane-dense matmul outside the
    # serial loop, emitted time-major (transpose folded into the einsum).
    # NOTE: at real sizes where 4H >> D this precomputed stream can dominate
    # HBM traffic; then compute the projection per-chunk inside the kernel
    # (DMA the raw (tt,BB,D) x block into a VMEM gates scratch) instead.
    xw = jnp.einsum("btd,gd->tbg", x, w_ih_p) + bias_p                   # (Tm, Bp, 4Hp)

    n_chunks = -(-t_max // tt)
    t_pad = n_chunks * tt
    if t_pad != t_max:
        xw = jnp.pad(xw, ((0, t_pad - t_max), (0, 0), (0, 0)))
    xw = xw.astype(mxu_dtype)            # bf16 on v6e/v7x halves DMA/VMEM bytes
    w_hhT = w_hh_p.T.astype(mxu_dtype)                                   # (Hp, 4Hp)

    grid_spec = pltpu.PrefetchScalarGridSpec(
        num_scalar_prefetch=0,
        # batch blocks are independent ("parallel", shards across v7x's two
        # TensorCores); the time-chunk axis carries h/c state ("arbitrary").
        grid=(n_bb, n_chunks),
        in_specs=[
            pl.BlockSpec((tt, b_block, 4 * Hp), lambda b, i: (i, b, 0)),  # xw
            pl.BlockSpec((b_block, 1), lambda b, i: (b, 0)),              # lengths
            # Constant block (index_map is grid-invariant).  At real H,
            # single-buffer it (pl.Buffered(1) / manual copy) to reclaim VMEM;
            # negligible at Hp=128 (~256 KiB).
            pl.BlockSpec((Hp, 4 * Hp), lambda b, i: (0, 0)),              # W_hh^T
        ],
        out_specs=pl.BlockSpec((tt, b_block, Hp), lambda b, i: (i, b, 0)),
        scratch_shapes=[
            pltpu.VMEM((b_block, Hp), jnp.float32),   # h
            pltpu.VMEM((b_block, Hp), jnp.float32),   # c
        ],
    )

    out_tm = pl.pallas_call(
        lstm_chunk_kernel,
        out_shape=jax.ShapeDtypeStruct((t_pad, Bp, Hp), jnp.float32),
        grid_spec=grid_spec,
        compiler_params=pltpu.CompilerParams(
            dimension_semantics=("parallel", "arbitrary"),
            # Explicit VMEM budget (equal to the v6e/v7x default scoped limit,
            # far above what these blocks need).  Re-derive against v7x's
            # 64 MiB physical VMEM when tt / Hp / b_block scale up.
            vmem_limit_bytes=32 * 1024 * 1024,
        ),
    )(xw, len_arr, w_hhT)

    out = out_tm[:t_max]                                                 # (Tm, Bp, Hp)

    # ---- Fused heads, hoisted out of the recurrence: one (Hp, S+2) matmul
    # with the batch-first transpose folded in; hidden padding is zero-padded
    # in the K dim so results are exact.
    w_heads = jnp.concatenate(
        [params["w_s"], params["w_r"], params["w_d"]], axis=0).astype(jnp.float32)
    w_heads = jnp.pad(w_heads, ((0, 0), (0, Hp - H)))                    # (S+2, Hp)
    b_heads = jnp.concatenate(
        [params["b_s"], params["b_r"], params["b_d"]], axis=0).astype(jnp.float32)

    heads = jnp.einsum("tbh,fh->btf", out, w_heads) + b_heads            # (Bp, Tm, S+2)
    heads = heads[:B]
    next_state = heads[..., :S]
    reward = heads[..., S:S + 1]
    done = jax.nn.sigmoid(heads[..., S + 1:S + 2])
    return next_state, reward, done


def init_params(key, state_dim, action_dim, hidden):
    """Deterministic init matching the nn.Module's parameter shapes."""
    D = state_dim + action_dim
    bound = 1.0 / np.sqrt(hidden)
    ks = jax.random.split(key, 10)
    u = lambda kk, shape: jax.random.uniform(kk, shape, jnp.float32, -bound, bound)
    return dict(
        w_ih=u(ks[0], (4 * hidden, D)),       # LSTM weight_ih_l0
        w_hh=u(ks[1], (4 * hidden, hidden)),  # LSTM weight_hh_l0
        b_ih=u(ks[2], (4 * hidden,)),
        b_hh=u(ks[3], (4 * hidden,)),
        w_s=u(ks[4], (state_dim, hidden)),    # state_head
        b_s=u(ks[5], (state_dim,)),
        w_r=u(ks[6], (1, hidden)),            # reward_head
        b_r=u(ks[7], (1,)),
        w_d=u(ks[8], (1, hidden)),            # done_head linear
        b_d=u(ks[9], (1,)),
    )


def reference_forward(states, actions, lengths, params):
    """Pure-JAX reference mirroring PyTorch packed-LSTM semantics."""
    x = jnp.concatenate([states, actions], axis=-1)
    B, T, _ = x.shape
    H = params["w_hh"].shape[1]
    h = jnp.zeros((B, H), jnp.float32)
    c = jnp.zeros((B, H), jnp.float32)
    lens = jnp.asarray(lengths, jnp.int32)
    outs = []
    for t in range(T):
        gates = (x[:, t] @ params["w_ih"].T + h @ params["w_hh"].T
                 + params["b_ih"] + params["b_hh"])
        i = jax.nn.sigmoid(gates[:, :H])
        f = jax.nn.sigmoid(gates[:, H:2 * H])
        g = jnp.tanh(gates[:, 2 * H:3 * H])
        o = jax.nn.sigmoid(gates[:, 3 * H:])
        c_new = f * c + i * g
        h_new = o * jnp.tanh(c_new)
        valid = (t < lens)[:, None].astype(jnp.float32)
        h = valid * h_new + (1 - valid) * h
        c = valid * c_new + (1 - valid) * c
        outs.append(valid * h_new)
    t_max = int(np.max(np.asarray(lengths)))
    out = jnp.stack(outs, axis=1)[:, :t_max]
    ns = out @ params["w_s"].T + params["b_s"]
    rw = out @ params["w_r"].T + params["b_r"]
    dn = jax.nn.sigmoid(out @ params["w_d"].T + params["b_d"])
    return ns, rw, dn


if __name__ == "__main__":
    B, T = 2, 8
    state_dim, action_dim, hidden = 4, 2, 32
    lengths = np.array([7, 4], dtype=np.int32)   # variable-length sequences

    key = jax.random.PRNGKey(0)
    k_s, k_a, k_p = jax.random.split(key, 3)
    states = jax.random.normal(k_s, (B, T, state_dim), jnp.float32)
    actions = jax.random.normal(k_a, (B, T, action_dim), jnp.float32)
    params = init_params(k_p, state_dim, action_dim, hidden)

    ns_ref, rw_ref, dn_ref = reference_forward(states, actions, lengths, params)
    t_max = int(lengths.max())

    # f32 MXU operands: padding is exact, so this matches the reference tightly.
    # tt=4 exercises the cross-chunk h/c carry (2 time chunks).
    ns, rw, dn = world_model_forward(states, actions, lengths, params,
                                     tt=4, mxu_dtype=jnp.float32)
    jax.block_until_ready((ns, rw, dn))
    assert ns.shape == (B, t_max, state_dim)
    assert rw.shape == (B, t_max, 1)
    assert dn.shape == (B, t_max, 1)
    np.testing.assert_allclose(np.asarray(ns), np.asarray(ns_ref), atol=1e-4, rtol=1e-4)
    np.testing.assert_allclose(np.asarray(rw), np.asarray(rw_ref), atol=1e-4, rtol=1e-4)
    np.testing.assert_allclose(np.asarray(dn), np.asarray(dn_ref), atol=1e-4, rtol=1e-4)

    # bf16 MXU operands (recommended for v6e/v7x): same kernel, f32 accumulate
    # and gate math; loose sanity tolerance against the f32 reference.
    ns16, rw16, dn16 = world_model_forward(states, actions, lengths, params,
                                           tt=4, mxu_dtype=jnp.bfloat16)
    jax.block_until_ready((ns16, rw16, dn16))
    np.testing.assert_allclose(np.asarray(ns16), np.asarray(ns_ref), atol=1e-1, rtol=1e-1)
    np.testing.assert_allclose(np.asarray(rw16), np.asarray(rw_ref), atol=1e-1, rtol=1e-1)
    np.testing.assert_allclose(np.asarray(dn16), np.asarray(dn_ref), atol=1e-1, rtol=1e-1)

    print("KERNEL_OK")
</pallas_src>

<mosaic_0001>
module attributes {stable_mosaic.version = 11 : i64} {
  func.func @lstm_chunk_kernel(%arg0: i32, %arg1: i32, %arg2: memref<4x8x512xf32, #tpu.memory_space<vmem>>, %arg3: memref<8x1xi32, #tpu.memory_space<vmem>>, %arg4: memref<128x512xf32, #tpu.memory_space<vmem>>, %arg5: memref<4x8x128xf32, #tpu.memory_space<vmem>>, %arg6: memref<8x128xf32, #tpu.memory_space<vmem>>, %arg7: memref<8x128xf32, #tpu.memory_space<vmem>>) attributes {dimension_semantics = [#tpu.dimension_semantics<parallel>, #tpu.dimension_semantics<arbitrary>], iteration_bounds = array<i64: 1, 2>, scalar_prefetch = 0 : i64, scratch_operands = 2 : i64, tpu.core_type = #tpu.core_type<tc>, window_params = [{transform_indices = @transform_0, window_bounds = array<i64: 4, 8, 512>}, {transform_indices = @transform_1, window_bounds = array<i64: 8, 1>}, {pipeline_mode = #tpu.pipeline_mode<synchronous>, transform_indices = @transform_2, window_bounds = array<i64: 128, 512>}, {transform_indices = @transform_3, window_bounds = array<i64: 4, 8, 128>}]} {
    %c0_i32 = arith.constant 0 : i32
    %0 = arith.cmpi eq, %arg1, %c0_i32 : i32
    %1 = arith.extui %0 : i1 to i32
    %c0_i32_0 = arith.constant 0 : i32
    %2 = arith.cmpi ne, %1, %c0_i32_0 : i32
    scf.if %2 {
      %cst_55 = arith.constant 0.000000e+00 : f32
      %201 = vector.broadcast %cst_55 : f32 to vector<8x128xf32>
      %c0_56 = arith.constant 0 : index
      %c0_57 = arith.constant 0 : index
      %202 = vector.load %arg6[%c0_56, %c0_57] : memref<8x128xf32, #tpu.memory_space<vmem>>, vector<8x128xf32>
      tpu.vector_store %arg6[%c0_56, %c0_57], %201 {strides = array<i32>} : memref<8x128xf32, #tpu.memory_space<vmem>>, vector<8x128xf32>,
      %cst_58 = arith.constant 0.000000e+00 : f32
      %203 = vector.broadcast %cst_58 : f32 to vector<8x128xf32>
      %c0_59 = arith.constant 0 : index
      %c0_60 = arith.constant 0 : index
      %204 = vector.load %arg7[%c0_59, %c0_60] : memref<8x128xf32, #tpu.memory_space<vmem>>, vector<8x128xf32>
      tpu.vector_store %arg7[%c0_59, %c0_60], %203 {strides = array<i32>} : memref<8x128xf32, #tpu.memory_space<vmem>>, vector<8x128xf32>,
    } else {
    }
    %c0 = arith.constant 0 : index
    %c0_1 = arith.constant 0 : index
    %3 = vector.load %arg3[%c0, %c0_1] : memref<8x1xi32, #tpu.memory_space<vmem>>, vector<8x1xi32>
    %c4_i32 = arith.constant 4 : i32
    %4 = arith.muli %arg1, %c4_i32 : i32
    %c0_2 = arith.constant 0 : index
    %c0_3 = arith.constant 0 : index
    %5 = vector.load %arg6[%c0_2, %c0_3] : memref<8x128xf32, #tpu.memory_space<vmem>>, vector<8x128xf32>
    %c0_4 = arith.constant 0 : index
    %c0_5 = arith.constant 0 : index
    %6 = vector.load %arg7[%c0_4, %c0_5] : memref<8x128xf32, #tpu.memory_space<vmem>>, vector<8x128xf32>
    %c0_i32_6 = arith.constant 0 : i32
    %7 = arith.index_cast %c0_i32_6 : i32 to index
    %c0_7 = arith.constant 0 : index
    %c0_8 = arith.constant 0 : index
    %8 = vector.load %arg2[%7, %c0_7, %c0_8] : memref<4x8x512xf32, #tpu.memory_space<vmem>>, vector<1x8x512xf32>
    %9 = vector.shape_cast %8 : vector<1x8x512xf32> to vector<8x512xf32>
    %c0_9 = arith.constant 0 : index
    %c0_10 = arith.constant 0 : index
    %10 = vector.load %arg4[%c0_9, %c0_10] : memref<128x512xf32, #tpu.memory_space<vmem>>, vector<128x512xf32>
    %cst = arith.constant dense<0.000000e+00> : vector<8x512xf32>
    %11 = tpu.matmul %5, %10, %cst {dimension_numbers = #tpu.dot_dimension_numbers<[1], [0], [0], [1], [0, 0, 1, 1], [], []>} : vector<8x128xf32>, vector<128x512xf32>, vector<8x512xf32> -> vector<8x512xf32>
    %12 = arith.addf %9, %11 : vector<8x512xf32>
    %13 = vector.extract_strided_slice %12 {offsets = [0, 0], sizes = [8, 128], strides = [1, 1]} : vector<8x512xf32> to vector<8x128xf32>
    %14 = arith.negf %13 : vector<8x128xf32>
    %15 = math.exp %14 : vector<8x128xf32>
    %cst_11 = arith.constant 1.000000e+00 : f32
    %16 = vector.broadcast %cst_11 : f32 to vector<8x128xf32>
    %17 = arith.addf %16, %15 : vector<8x128xf32>
    %18 = arith.divf %16, %17 : vector<8x128xf32>
    %19 = vector.extract_strided_slice %12 {offsets = [0, 128], sizes = [8, 128], strides = [1, 1]} : vector<8x512xf32> to vector<8x128xf32>
    %20 = arith.negf %19 : vector<8x128xf32>
    %21 = math.exp %20 : vector<8x128xf32>
    %cst_12 = arith.constant 1.000000e+00 : f32
    %22 = vector.broadcast %cst_12 : f32 to vector<8x128xf32>
    %23 = arith.addf %22, %21 : vector<8x128xf32>
    %24 = arith.divf %22, %23 : vector<8x128xf32>
    %25 = vector.extract_strided_slice %12 {offsets = [0, 256], sizes = [8, 128], strides = [1, 1]} : vector<8x512xf32> to vector<8x128xf32>
    %26 = math.tanh %25 : vector<8x128xf32>
    %27 = vector.extract_strided_slice %12 {offsets = [0, 384], sizes = [8, 128], strides = [1, 1]} : vector<8x512xf32> to vector<8x128xf32>
    %28 = arith.negf %27 : vector<8x128xf32>
    %29 = math.exp %28 : vector<8x128xf32>
    %cst_13 = arith.constant 1.000000e+00 : f32
    %30 = vector.broadcast %cst_13 : f32 to vector<8x128xf32>
    %31 = arith.addf %30, %29 : vector<8x128xf32>
    %32 = arith.divf %30, %31 : vector<8x128xf32>
    %33 = arith.mulf %24, %6 : vector<8x128xf32>
    %34 = arith.mulf %18, %26 : vector<8x128xf32>
    %35 = arith.addf %33, %34 : vector<8x128xf32>
    %36 = math.tanh %35 : vector<8x128xf32>
    %37 = arith.mulf %32, %36 : vector<8x128xf32>
    %38 = arith.addi %4, %c0_i32_6 : i32
    %39 = vector.broadcast %38 : i32 to vector<8x1xi32>
    %40 = arith.cmpi slt, %39, %3 : vector<8x1xi32>
    %41 = vector.shape_cast %40 : vector<8x1xi1> to vector<8x1xi1>
    %42 = vector.broadcast %41 : vector<8x1xi1> to vector<8x128xi1>
    %43 = arith.select %42, %37, %5 : vector<8x128xi1>, vector<8x128xf32>
    %44 = vector.shape_cast %40 : vector<8x1xi1> to vector<8x1xi1>
    %45 = vector.broadcast %44 : vector<8x1xi1> to vector<8x128xi1>
    %46 = arith.select %45, %35, %6 : vector<8x128xi1>, vector<8x128xf32>
    %cst_14 = arith.constant 0.000000e+00 : f32
    %47 = vector.shape_cast %40 : vector<8x1xi1> to vector<8x1xi1>
    %48 = vector.broadcast %47 : vector<8x1xi1> to vector<8x128xi1>
    %49 = vector.broadcast %cst_14 : f32 to vector<8x128xf32>
    %50 = arith.select %48, %37, %49 : vector<8x128xi1>, vector<8x128xf32>
    %51 = arith.index_cast %c0_i32_6 : i32 to index
    %c0_15 = arith.constant 0 : index
    %c0_16 = arith.constant 0 : index
    %52 = vector.load %arg5[%51, %c0_15, %c0_16] : memref<4x8x128xf32, #tpu.memory_space<vmem>>, vector<1x8x128xf32>
    %53 = vector.shape_cast %52 : vector<1x8x128xf32> to vector<8x128xf32>
    %54 = vector.shape_cast %50 : vector<8x128xf32> to vector<1x8x128xf32>
    tpu.vector_store %arg5[%51, %c0_15, %c0_16], %54 {strides = array<i32>} : memref<4x8x128xf32, #tpu.memory_space<vmem>>, vector<1x8x128xf32>,
    %c1_i32 = arith.constant 1 : i32
    %55 = arith.index_cast %c1_i32 : i32 to index
    %c0_17 = arith.constant 0 : index
    %c0_18 = arith.constant 0 : index
    %56 = vector.load %arg2[%55, %c0_17, %c0_18] : memref<4x8x512xf32, #tpu.memory_space<vmem>>, vector<1x8x512xf32>
    %57 = vector.shape_cast %56 : vector<1x8x512xf32> to vector<8x512xf32>
    %c0_19 = arith.constant 0 : index
    %c0_20 = arith.constant 0 : index
    %58 = vector.load %arg4[%c0_19, %c0_20] : memref<128x512xf32, #tpu.memory_space<vmem>>, vector<128x512xf32>
    %cst_21 = arith.constant dense<0.000000e+00> : vector<8x512xf32>
    %59 = tpu.matmul %43, %58, %cst_21 {dimension_numbers = #tpu.dot_dimension_numbers<[1], [0], [0], [1], [0, 0, 1, 1], [], []>} : vector<8x128xf32>, vector<128x512xf32>, vector<8x512xf32> -> vector<8x512xf32>
    %60 = arith.addf %57, %59 : vector<8x512xf32>
    %61 = vector.extract_strided_slice %60 {offsets = [0, 0], sizes = [8, 128], strides = [1, 1]} : vector<8x512xf32> to vector<8x128xf32>
    %62 = arith.negf %61 : vector<8x128xf32>
    %63 = math.exp %62 : vector<8x128xf32>
    %cst_22 = arith.constant 1.000000e+00 : f32
    %64 = vector.broadcast %cst_22 : f32 to vector<8x128xf32>
    %65 = arith.addf %64, %63 : vector<8x128xf32>
    %66 = arith.divf %64, %65 : vector<8x128xf32>
    %67 = vector.extract_strided_slice %60 {offsets = [0, 128], sizes = [8, 128], strides = [1, 1]} : vector<8x512xf32> to vector<8x128xf32>
    %68 = arith.negf %67 : vector<8x128xf32>
    %69 = math.exp %68 : vector<8x128xf32>
    %cst_23 = arith.constant 1.000000e+00 : f32
    %70 = vector.broadcast %cst_23 : f32 to vector<8x128xf32>
    %71 = arith.addf %70, %69 : vector<8x128xf32>
    %72 = arith.divf %70, %71 : vector<8x128xf32>
    %73 = vector.extract_strided_slice %60 {offsets = [0, 256], sizes = [8, 128], strides = [1, 1]} : vector<8x512xf32> to vector<8x128xf32>
    %74 = math.tanh %73 : vector<8x128xf32>
    %75 = vector.extract_strided_slice %60 {offsets = [0, 384], sizes = [8, 128], strides = [1, 1]} : vector<8x512xf32> to vector<8x128xf32>
    %76 = arith.negf %75 : vector<8x128xf32>
    %77 = math.exp %76 : vector<8x128xf32>
    %cst_24 = arith.constant 1.000000e+00 : f32
    %78 = vector.broadcast %cst_24 : f32 to vector<8x128xf32>
    %79 = arith.addf %78, %77 : vector<8x128xf32>
    %80 = arith.divf %78, %79 : vector<8x128xf32>
    %81 = arith.mulf %72, %46 : vector<8x128xf32>
    %82 = arith.mulf %66, %74 : vector<8x128xf32>
    %83 = arith.addf %81, %82 : vector<8x128xf32>
    %84 = math.tanh %83 : vector<8x128xf32>
    %85 = arith.mulf %80, %84 : vector<8x128xf32>
    %86 = arith.addi %4, %c1_i32 : i32
    %87 = vector.broadcast %86 : i32 to vector<8x1xi32>
    %88 = arith.cmpi slt, %87, %3 : vector<8x1xi32>
    %89 = vector.shape_cast %88 : vector<8x1xi1> to vector<8x1xi1>
    %90 = vector.broadcast %89 : vector<8x1xi1> to vector<8x128xi1>
    %91 = arith.select %90, %85, %43 : vector<8x128xi1>, vector<8x128xf32>
    %92 = vector.shape_cast %88 : vector<8x1xi1> to vector<8x1xi1>
    %93 = vector.broadcast %92 : vector<8x1xi1> to vector<8x128xi1>
    %94 = arith.select %93, %83, %46 : vector<8x128xi1>, vector<8x128xf32>
    %cst_25 = arith.constant 0.000000e+00 : f32
    %95 = vector.shape_cast %88 : vector<8x1xi1> to vector<8x1xi1>
    %96 = vector.broadcast %95 : vector<8x1xi1> to vector<8x128xi1>
    %97 = vector.broadcast %cst_25 : f32 to vector<8x128xf32>
    %98 = arith.select %96, %85, %97 : vector<8x128xi1>, vector<8x128xf32>
    %99 = arith.index_cast %c1_i32 : i32 to index
    %c0_26 = arith.constant 0 : index
    %c0_27 = arith.constant 0 : index
    %100 = vector.load %arg5[%99, %c0_26, %c0_27] : memref<4x8x128xf32, #tpu.memory_space<vmem>>, vector<1x8x128xf32>
    %101 = vector.shape_cast %100 : vector<1x8x128xf32> to vector<8x128xf32>
    %102 = vector.shape_cast %98 : vector<8x128xf32> to vector<1x8x128xf32>
    tpu.vector_store %arg5[%99, %c0_26, %c0_27], %102 {strides = array<i32>} : memref<4x8x128xf32, #tpu.memory_space<vmem>>, vector<1x8x128xf32>,
    %c2_i32 = arith.constant 2 : i32
    %103 = arith.index_cast %c2_i32 : i32 to index
    %c0_28 = arith.constant 0 : index
    %c0_29 = arith.constant 0 : index
    %104 = vector.load %arg2[%103, %c0_28, %c0_29] : memref<4x8x512xf32, #tpu.memory_space<vmem>>, vector<1x8x512xf32>
    %105 = vector.shape_cast %104 : vector<1x8x512xf32> to vector<8x512xf32>
    %c0_30 = arith.constant 0 : index
    %c0_31 = arith.constant 0 : index
    %106 = vector.load %arg4[%c0_30, %c0_31] : memref<128x512xf32, #tpu.memory_space<vmem>>, vector<128x512xf32>
    %cst_32 = arith.constant dense<0.000000e+00> : vector<8x512xf32>
    %107 = tpu.matmul %91, %106, %cst_32 {dimension_numbers = #tpu.dot_dimension_numbers<[1], [0], [0], [1], [0, 0, 1, 1], [], []>} : vector<8x128xf32>, vector<128x512xf32>, vector<8x512xf32> -> vector<8x512xf32>
    %108 = arith.addf %105, %107 : vector<8x512xf32>
    %109 = vector.extract_strided_slice %108 {offsets = [0, 0], sizes = [8, 128], strides = [1, 1]} : vector<8x512xf32> to vector<8x128xf32>
    %110 = arith.negf %109 : vector<8x128xf32>
    %111 = math.exp %110 : vector<8x128xf32>
    %cst_33 = arith.constant 1.000000e+00 : f32
    %112 = vector.broadcast %cst_33 : f32 to vector<8x128xf32>
    %113 = arith.addf %112, %111 : vector<8x128xf32>
    %114 = arith.divf %112, %113 : vector<8x128xf32>
    %115 = vector.extract_strided_slice %108 {offsets = [0, 128], sizes = [8, 128], strides = [1, 1]} : vector<8x512xf32> to vector<8x128xf32>
    %116 = arith.negf %115 : vector<8x128xf32>
    %117 = math.exp %116 : vector<8x128xf32>
    %cst_34 = arith.constant 1.000000e+00 : f32
    %118 = vector.broadcast %cst_34 : f32 to vector<8x128xf32>
    %119 = arith.addf %118, %117 : vector<8x128xf32>
    %120 = arith.divf %118, %119 : vector<8x128xf32>
    %121 = vector.extract_strided_slice %108 {offsets = [0, 256], sizes = [8, 128], strides = [1, 1]} : vector<8x512xf32> to vector<8x128xf32>
    %122 = math.tanh %121 : vector<8x128xf32>
    %123 = vector.extract_strided_slice %108 {offsets = [0, 384], sizes = [8, 128], strides = [1, 1]} : vector<8x512xf32> to vector<8x128xf32>
    %124 = arith.negf %123 : vector<8x128xf32>
    %125 = math.exp %124 : vector<8x128xf32>
    %cst_35 = arith.constant 1.000000e+00 : f32
    %126 = vector.broadcast %cst_35 : f32 to vector<8x128xf32>
    %127 = arith.addf %126, %125 : vector<8x128xf32>
    %128 = arith.divf %126, %127 : vector<8x128xf32>
    %129 = arith.mulf %120, %94 : vector<8x128xf32>
    %130 = arith.mulf %114, %122 : vector<8x128xf32>
    %131 = arith.addf %129, %130 : vector<8x128xf32>
    %132 = math.tanh %131 : vector<8x128xf32>
    %133 = arith.mulf %128, %132 : vector<8x128xf32>
    %134 = arith.addi %4, %c2_i32 : i32
    %135 = vector.broadcast %134 : i32 to vector<8x1xi32>
    %136 = arith.cmpi slt, %135, %3 : vector<8x1xi32>
    %137 = vector.shape_cast %136 : vector<8x1xi1> to vector<8x1xi1>
    %138 = vector.broadcast %137 : vector<8x1xi1> to vector<8x128xi1>
    %139 = arith.select %138, %133, %91 : vector<8x128xi1>, vector<8x128xf32>
    %140 = vector.shape_cast %136 : vector<8x1xi1> to vector<8x1xi1>
    %141 = vector.broadcast %140 : vector<8x1xi1> to vector<8x128xi1>
    %142 = arith.select %141, %131, %94 : vector<8x128xi1>, vector<8x128xf32>
    %cst_36 = arith.constant 0.000000e+00 : f32
    %143 = vector.shape_cast %136 : vector<8x1xi1> to vector<8x1xi1>
    %144 = vector.broadcast %143 : vector<8x1xi1> to vector<8x128xi1>
    %145 = vector.broadcast %cst_36 : f32 to vector<8x128xf32>
    %146 = arith.select %144, %133, %145 : vector<8x128xi1>, vector<8x128xf32>
    %147 = arith.index_cast %c2_i32 : i32 to index
    %c0_37 = arith.constant 0 : index
    %c0_38 = arith.constant 0 : index
    %148 = vector.load %arg5[%147, %c0_37, %c0_38] : memref<4x8x128xf32, #tpu.memory_space<vmem>>, vector<1x8x128xf32>
    %149 = vector.shape_cast %148 : vector<1x8x128xf32> to vector<8x128xf32>
    %150 = vector.shape_cast %146 : vector<8x128xf32> to vector<1x8x128xf32>
    tpu.vector_store %arg5[%147, %c0_37, %c0_38], %150 {strides = array<i32>} : memref<4x8x128xf32, #tpu.memory_space<vmem>>, vector<1x8x128xf32>,
    %c3_i32 = arith.constant 3 : i32
    %151 = arith.index_cast %c3_i32 : i32 to index
    %c0_39 = arith.constant 0 : index
    %c0_40 = arith.constant 0 : index
    %152 = vector.load %arg2[%151, %c0_39, %c0_40] : memref<4x8x512xf32, #tpu.memory_space<vmem>>, vector<1x8x512xf32>
    %153 = vector.shape_cast %152 : vector<1x8x512xf32> to vector<8x512xf32>
    %c0_41 = arith.constant 0 : index
    %c0_42 = arith.constant 0 : index
    %154 = vector.load %arg4[%c0_41, %c0_42] : memref<128x512xf32, #tpu.memory_space<vmem>>, vector<128x512xf32>
    %cst_43 = arith.constant dense<0.000000e+00> : vector<8x512xf32>
    %155 = tpu.matmul %139, %154, %cst_43 {dimension_numbers = #tpu.dot_dimension_numbers<[1], [0], [0], [1], [0, 0, 1, 1], [], []>} : vector<8x128xf32>, vector<128x512xf32>, vector<8x512xf32> -> vector<8x512xf32>
    %156 = arith.addf %153, %155 : vector<8x512xf32>
    %157 = vector.extract_strided_slice %156 {offsets = [0, 0], sizes = [8, 128], strides = [1, 1]} : vector<8x512xf32> to vector<8x128xf32>
    %158 = arith.negf %157 : vector<8x128xf32>
    %159 = math.exp %158 : vector<8x128xf32>
    %cst_44 = arith.constant 1.000000e+00 : f32
    %160 = vector.broadcast %cst_44 : f32 to vector<8x128xf32>
    %161 = arith.addf %160, %159 : vector<8x128xf32>
    %162 = arith.divf %160, %161 : vector<8x128xf32>
    %163 = vector.extract_strided_slice %156 {offsets = [0, 128], sizes = [8, 128], strides = [1, 1]} : vector<8x512xf32> to vector<8x128xf32>
    %164 = arith.negf %163 : vector<8x128xf32>
    %165 = math.exp %164 : vector<8x128xf32>
    %cst_45 = arith.constant 1.000000e+00 : f32
    %166 = vector.broadcast %cst_45 : f32 to vector<8x128xf32>
    %167 = arith.addf %166, %165 : vector<8x128xf32>
    %168 = arith.divf %166, %167 : vector<8x128xf32>
    %169 = vector.extract_strided_slice %156 {offsets = [0, 256], sizes = [8, 128], strides = [1, 1]} : vector<8x512xf32> to vector<8x128xf32>
    %170 = math.tanh %169 : vector<8x128xf32>
    %171 = vector.extract_strided_slice %156 {offsets = [0, 384], sizes = [8, 128], strides = [1, 1]} : vector<8x512xf32> to vector<8x128xf32>
    %172 = arith.negf %171 : vector<8x128xf32>
    %173 = math.exp %172 : vector<8x128xf32>
    %cst_46 = arith.constant 1.000000e+00 : f32
    %174 = vector.broadcast %cst_46 : f32 to vector<8x128xf32>
    %175 = arith.addf %174, %173 : vector<8x128xf32>
    %176 = arith.divf %174, %175 : vector<8x128xf32>
    %177 = arith.mulf %168, %142 : vector<8x128xf32>
    %178 = arith.mulf %162, %170 : vector<8x128xf32>
    %179 = arith.addf %177, %178 : vector<8x128xf32>
    %180 = math.tanh %179 : vector<8x128xf32>
    %181 = arith.mulf %176, %180 : vector<8x128xf32>
    %182 = arith.addi %4, %c3_i32 : i32
    %183 = vector.broadcast %182 : i32 to vector<8x1xi32>
    %184 = arith.cmpi slt, %183, %3 : vector<8x1xi32>
    %185 = vector.shape_cast %184 : vector<8x1xi1> to vector<8x1xi1>
    %186 = vector.broadcast %185 : vector<8x1xi1> to vector<8x128xi1>
    %187 = arith.select %186, %181, %139 : vector<8x128xi1>, vector<8x128xf32>
    %188 = vector.shape_cast %184 : vector<8x1xi1> to vector<8x1xi1>
    %189 = vector.broadcast %188 : vector<8x1xi1> to vector<8x128xi1>
    %190 = arith.select %189, %179, %142 : vector<8x128xi1>, vector<8x128xf32>
    %cst_47 = arith.constant 0.000000e+00 : f32
    %191 = vector.shape_cast %184 : vector<8x1xi1> to vector<8x1xi1>
    %192 = vector.broadcast %191 : vector<8x1xi1> to vector<8x128xi1>
    %193 = vector.broadcast %cst_47 : f32 to vector<8x128xf32>
    %194 = arith.select %192, %181, %193 : vector<8x128xi1>, vector<8x128xf32>
    %195 = arith.index_cast %c3_i32 : i32 to index
    %c0_48 = arith.constant 0 : index
    %c0_49 = arith.constant 0 : index
    %196 = vector.load %arg5[%195, %c0_48, %c0_49] : memref<4x8x128xf32, #tpu.memory_space<vmem>>, vector<1x8x128xf32>
    %197 = vector.shape_cast %196 : vector<1x8x128xf32> to vector<8x128xf32>
    %198 = vector.shape_cast %194 : vector<8x128xf32> to vector<1x8x128xf32>
    tpu.vector_store %arg5[%195, %c0_48, %c0_49], %198 {strides = array<i32>} : memref<4x8x128xf32, #tpu.memory_space<vmem>>, vector<1x8x128xf32>,
    %c4_i32_50 = arith.constant 4 : i32
    %c0_51 = arith.constant 0 : index
    %c0_52 = arith.constant 0 : index
    %199 = vector.load %arg6[%c0_51, %c0_52] : memref<8x128xf32, #tpu.memory_space<vmem>>, vector<8x128xf32>
    tpu.vector_store %arg6[%c0_51, %c0_52], %187 {strides = array<i32>} : memref<8x128xf32, #tpu.memory_space<vmem>>, vector<8x128xf32>,
    %c0_53 = arith.constant 0 : index
    %c0_54 = arith.constant 0 : index
    %200 = vector.load %arg7[%c0_53, %c0_54] : memref<8x128xf32, #tpu.memory_space<vmem>>, vector<8x128xf32>
    tpu.vector_store %arg7[%c0_53, %c0_54], %190 {strides = array<i32>} : memref<8x128xf32, #tpu.memory_space<vmem>>, vector<8x128xf32>,
    return
  }
  func.func @transform_0(%arg0: i32, %arg1: i32) -> (i32, i32, i32) {
    %c0_i32 = arith.constant 0 : i32
    %c0_i32_0 = arith.constant 0 : i32
    return %arg1, %arg0, %c0_i32 : i32, i32, i32
  }
  func.func @transform_1(%arg0: i32, %arg1: i32) -> (i32, i32) {
    %c0_i32 = arith.constant 0 : i32
    %c0_i32_0 = arith.constant 0 : i32
    return %arg0, %c0_i32 : i32, i32
  }
  func.func @transform_2(%arg0: i32, %arg1: i32) -> (i32, i32) {
    %c0_i32 = arith.constant 0 : i32
    %c0_i32_0 = arith.constant 0 : i32
    %c0_i32_1 = arith.constant 0 : i32
    return %c0_i32, %c0_i32_0 : i32, i32
  }
  func.func @transform_3(%arg0: i32, %arg1: i32) -> (i32, i32, i32) {
    %c0_i32 = arith.constant 0 : i32
    %c0_i32_0 = arith.constant 0 : i32
    return %arg1, %arg0, %c0_i32 : i32, i32, i32
  }
}

</mosaic_0001>

<bundles_post_ra>
// kernel: tpu_custom_call.1
= control target key start
LH: loop header
LB: loop body
LE: loop exit
PB: predicated region body
PF: predicated region fallthrough
CT: control target
= control target key end

     0   :  { %8 = vsyncpa [#allocation5], 0  ;;  %s2363_s0 = inlined_call_operand.hbm [shape: f32[8,8,512], index: 0, kind: input, shape index: {}]   ;;  %s2364_s1 = inlined_call_operand.vmem [shape: s32[8,1], index: 1, kind: input, shape index: {}]   ;;  %s2365_s2 = inlined_call_operand.hbm [shape: f32[128,512], index: 2, kind: input, shape index: {}]   ;;  %s2366_s3 = inlined_call_operand.hbm [shape: f32[8,8,128], index: 3, kind: output, shape index: {}]  }
   0x1   :  { %10 = vsyncpa [#allocation5 + $0x1], 0 }
   0x2   :  { %11 = vsyncpa [#allocation8], 0 }
   0x3   :  { %12 = vsyncpa [#allocation6], 0 }
   0x4   :  { %14 = vsyncpa [#allocation6 + $0x1], 0  ;;  %s1752_s12 = smov 0   ;;  %s1754_s13 = smov 0  }
   0x5   :  { %s1756_s14 = smov 0   ;;  %s1758_s15 = smov 0  }
   0x6   :  { %s1760_s16 = smov 0   ;;  %s1762_s17 = smov 0  }
   0x7 LB: > { %s1385_s18 = sadd.s32 4294967295, %s1720_s17   ;;  %s1386_s19 = sadd.s32 4294967294, %s1720_s17   ;;  %s1720_s17 = sphi %s1762_s17, %s20_s17   ;;  %s1716_s16 = sphi %s1760_s16, %s2472_s16   ;;  %s1712_s15 = sphi %s1758_s15, %s2471_s15   ;;  %s1708_s14 = sphi %s1756_s14, %s2470_s14   ;;  %s1704_s13 = sphi %s1754_s13, %s2469_s13   ;;  %s1700_s12 = sphi %s1752_s12, %s2468_s12  }
   0x8   : > { %p54_p0 = scmp.ne.s32.totalorder %s1704_s13, %s1700_s12  ;;  %p1786_p1 = scmp.eq.s32.totalorder %s1385_s18, 0 }
   0x9   : > { %p1790_p2 = scmp.eq.s32.totalorder %s1385_s18, 1  ;;  %p133_p3 = scmp.eq.s32.totalorder %s1386_s19, 1 }
   0xa   : > { %p1796_p4 = por %p1786_p1, %p54_p0  ;;  %p1387_p5 = scmp.ge.s32.totalorder %s1720_s17, 1 }
   0xb   : > { %p1801_p6 = por %p133_p3, %p54_p0  ;;  %p140_p7 = scmp.lt.s32.totalorder %s1720_s17, 3 }
   0xc   : > { %s2406_s22 = scalar_select %p1796_p4, 1, 0 }
   0xd   : > { %s2407_s23 = scalar_select %p1801_p6, 1, 0 }
   0xe   : > { %p1806_p8 = pnand %p1387_p5, %p140_p7  ;;  %s1722_s25 = smov [#allocation7]  }
   0xf   : > { %s159_s26 = sshll.u32 %s1722_s25, 4  ;;  %s29_s28 = sadd.s32 1, %s1716_s16  ;;  %s160_s26 = int_to_ptr.vmem [resolvable:$true] %s159_s26 }
  0x10   : > { %p1444_p9 = pneg %p1806_p8  ;;  %s1593_s29 = scalar_lea.vmem %s160_s26, 8192 }
  0x11   : > { %p1594_p13 = scmp.ne.s32.totalorder %s160_s26, %s1593_s29  ;;  %p1601_p5 = scmp.lt.s32.totalorder %s160_s26, %s160_s26 }
  0x12   : > { %p1815_p11 = pnand %p1444_p9, %p1786_p1  ;;  %p1602_p7 = scmp.lt.s32.totalorder %s1593_s29, %s1593_s29 }
  0x14   : > { %p1584_p12 = pneg %p1815_p11  ;;  %p1603_p6 = por %p1602_p7, %p1601_p5 }
  0x16   : > { %p1596_p0 = pnand %p1594_p13, %p1584_p12 }
  0x18   : > { %p1597_p3 = pneg %p1596_p0 }
  0x1a   : > { %p1604_p4 = pnand %p1603_p6, %p1597_p3 }
  0x1c   : > { %1607 = shalt.err (!%p1604_p4)
}
  0x1d   : > { %s2368_s30 = smov 512   ;;  %s2369_s4 = smov 32  }
  0x1e   : > { %1447 = dma.hbm_to_vmem [thread:$0]  (!%p1815_p11), %s2365_s2, 8192, %s160_s26, [#allocation8], %s2368_s30, %s2368_s30, %s2369_s4  }
  0x1f   : > { %p30_p4 = scmp.ge.s32.totalorder %s29_s28, 2  ;;  %s41_s7 = sadd.s32 1, %s1708_s14 }
  0x20   : > { %p48_p6 = scmp.ne.s32.totalorder %s1708_s14, %s1704_s13  ;;  %p49_p9 = scmp.eq.s32.totalorder %s1720_s17, 0 }
  0x21   : > { %s2474_s28 = smov (%p30_p4, %s29_s28), 0  ;;  %p1457_p0 = scmp.lt.s32.totalorder %s1720_s17, 2 }
  0x22   : > { %p1836_p12 = por %p49_p9, %p48_p6  ;;  %p1842_p13 = por %p1790_p2, %p48_p6 }
  0x23   : > { %s36_s10 = ssub.s32 %s1716_s16, %s2474_s28  ;;  %s173_s11 = sand.u32 1, %s1708_s14  }
  0x24   : > { %p39_p11 = scmp.eq.s32.totalorder %s36_s10, 0  ;;  %s1391_s18 = sshll.u32 %s173_s11, 7 }
  0x25   : > { %s1434_s25 = sshll.u32 %s1716_s16, 11  ;;  %s177_s5 = scalar_lea.vmem [#allocation4], %s1391_s18 }
  0x26   : > { %s1851_s19 = scalar_select %p39_p11, %s1708_s14, %s41_s7  }
  0x27   : > { %s186_s29 = scalar_lea.hbm %s2363_s0, %s1434_s25  ;;  %s187_s6 = sshll.u32 %s177_s5, 4  ;;  %s188_s6 = int_to_ptr.vmem [resolvable:$true] %s187_s6 }
  0x28   : > { %p1859_p2 = pnand %p1457_p0, %p1836_p12  ;;  %s174_s30 = scalar_lea.sflag [#allocation5], %s173_s11 }
  0x29   : > { %s1621_s10 = scalar_lea.vmem %s188_s6, 2048  ;;  %s1725_s7 = smov [#allocation4]  }
  0x2a   : > { %p1610_p3 = pneg %p1859_p2  ;;  %p1622_p5 = scmp.ne.s32.totalorder %s188_s6, %s1621_s10 }
  0x2b   : > { %s1626_s4 = sshll.u32 %s1725_s7, 4  ;;  %s1627_s4 = int_to_ptr.vmem [resolvable:$false] %s1626_s4 }
  0x2c   : > { %p1624_p7 = pnand %p1622_p5, %p1610_p3  ;;  %s1628_s25 = scalar_lea.vmem %s1627_s4, 4096 }
  0x2d   : > { %p1629_p6 = scmp.lt.s32.totalorder %s188_s6, %s1627_s4  ;;  %p1630_p9 = scmp.lt.s32.totalorder %s1628_s25, %s1621_s10 }
  0x2e   : > { %p1625_p4 = pneg %p1624_p7 }
  0x2f   : > { %p1631_p11 = por %p1630_p9, %p1629_p6 }
  0x31   : > { %p1632_p10 = pnand %p1631_p11, %p1625_p4 }
  0x33   : > { %1635 = shalt.err (!%p1632_p10)
}
  0x34   : > { %s2413_s8 = smov 32   ;;  %s2414_s18 = smov 512  }
  0x35   : > { %1451 = dma.hbm_to_vmem [thread:$0]  (!%p1859_p2), %s186_s29, 2048, %s188_s6, %s174_s30, %s2414_s18, %s2414_s18, %s2413_s8  }
  0x36   : > { %199 = sbr.rel (%p1806_p8) target bundleno = 1121 (0x461), region = 32 }
  0x3b   : > { %s1873_s11 = sand.u32 1, %s1704_s13   ;;  %p2415_p10 = scmp.ne.s32.totalorder %s2406_s22, 0 }
  0x3c   : > { %s1396_s4 = sshll.u32 %s1873_s11, 7  ;;  %s202_s26 = scalar_lea.sflag [#allocation5], %s1873_s11 }
  0x3d   : > { %s1877_s27 = scalar_lea.vmem [#allocation4], %s1396_s4 }
  0x3e   : > { %1687 = dma.done.wait (%p2415_p10), %s202_s26, 2048  }
  0x3f   : > { %1689 = vsyncadd (%p2415_p10), %s202_s26, 4294965248 }
  0x40   : > { %1691 = dma.done.wait (%p1786_p1), [#allocation8], 8192  }
  0x41   : > { %1693 = vsyncadd (%p1786_p1), [#allocation8], 4294959104  ;;  %s1398_s24 = sshll.u32 %s1873_s11, 5  ;;  %p1399_p8 = scmp.ne.s32.totalorder %s1712_s15, 0 }
  0x42   : > { %s1888_s30 = scalar_lea.vmem [#allocation9], %s1398_s24 }
  0x43   : > { %245 = sbr.rel (%p1399_p8) target bundleno = 74 (0x4a), region = 44 }
  0x48   : > { %v1726_v0 = vmov 0.0  }
  0x49   : > { %246 = vst [vmem:[#allocation2] sm:$0xff] %v1726_v0  ;;  %247 = vst [vmem:[#allocation3] sm:$0xff] %v1726_v0 }
  0x4a PF: > { %v1891_v1 = vld [vmem:[#allocation7 + $0x1e8] sm:$0xff]  ;;  %v1893_v2 = vld [vmem:[#allocation7 + $0x1e0] sm:$0xff]  ;;  %v2370_v5 = vmov 0.0   ;;  %v2372_v8 = vmov 0   ;;  %v1916_v11 = vld [vmem:[#allocation7 + $0x1f8] sm:$0xff]  ;;  %s2025_s20 = sshll.u32 %s1712_s15, 2 }
  0x4b   : > { %v1895_v3 = vld [vmem:[#allocation7 + $0x1c8] sm:$0xff]  ;;  %320 = vmatprep.subr.mxu0 %v1891_v1  ;;  %v1898_v4 = vld [vmem:[#allocation7 + $0x1c0] sm:$0xff]  ;;  %384 = vmatprep.mubr.f32.mxu0 %v2370_v5  ;;  %2416 = vst [vmem:[#allocation13_spill] sm:$0xff] %v1916_v11  ;;  %v1922_v13 = vld [vmem:[#allocation7 + $0x1f0] sm:$0xff]  ;;  %v490_v55 = vstv %s2025_s20  ;;  %s740_s5 = sadd.s32 1, %s2025_s20  ;;  %s992_s6 = sadd.s32 2, %s2025_s20 }
  0x4c   : > { %321 = vmatpush1.msra.mxu0 %v1893_v2  ;;  %v1902_v6 = vld [vmem:[#allocation7 + $0x1a8] sm:$0xff]  ;;  %455 = vmatprep.mubr.f32.mxu1 %v2370_v5  ;;  %v1906_v7 = vld [vmem:[#allocation7 + $0x1a0] sm:$0xff]  ;;  %v1928_v15 = vld [vmem:[#allocation7 + $0x1d8] sm:$0xff]  ;;  %v741_v0 = vstv %s740_s5  ;;  %s1244_s21 = sadd.s32 3, %s2025_s20  ;;  %s1435_s10 = sshll.u32 %s1712_s15, 9 }
  0x4d   : > { %322 = vmatprep.subr.mxu0 %v1895_v3  ;;  %1516 = vset.pattern.permute.xlu0 %v2372_v8  ;;  %v1910_v9 = vld [vmem:[#allocation7 + $0x188] sm:$0xff]  ;;  %v1914_v10 = vld [vmem:[#allocation7 + $0x180] sm:$0xff]  ;;  %v1930_v16 = vld [vmem:[#allocation7 + $0x1d0] sm:$0xff]  ;;  %s1274_s7 = sshll.u32 %s1888_s30, 4  ;;  %s2312_s18 = scalar_lea.hbm %s2366_s3, %s1435_s10  ;;  %s2314_s7 = int_to_ptr.vmem [resolvable:$true] %s1274_s7 }
  0x4e   : > { %323 = vmatpush1.msra.mxu0 %v1898_v4  ;;  %1517 = vset.pattern.permute.xlu1 %v2372_v8  ;;  %v1919_v12 = vld [vmem:[#allocation7 + $0x168] sm:$0xff]  ;;  %v1925_v14 = vld [vmem:[#allocation7 + $0x160] sm:$0xff]  ;;  %v1936_v18 = vld [vmem:[#allocation7 + $0x1b8] sm:$0xff]  ;;  %s1260_s4 = scalar_lea.sflag [#allocation6], %s1873_s11  ;;  %s1636_s15 = scalar_lea.vmem %s2314_s7, 512 }
  0x4f   : > { %324 = vmatprep.subr.mxu0 %v1902_v6  ;;  %391 = vmatprep.subr.mxu1 %v1916_v11  ;;  %v1933_v17 = vld [vmem:[#allocation7 + $0x148] sm:$0xff]  ;;  %v1939_v19 = vld [vmem:[#allocation7 + $0x140] sm:$0xff]  ;;  %v1942_v20 = vld [vmem:[#allocation7 + $0x1b0] sm:$0xff]  ;;  %p1637_p1 = scmp.ne.s32.totalorder %s2314_s7, %s1636_s15  ;;  %s1729_s26 = smov [#allocation9]  }
  0x50   : > { %325 = vmatpush1.msra.mxu0 %v1906_v7  ;;  %392 = vmatpush1.msra.mxu1 %v1922_v13  ;;  %v1944_v21 = vld [vmem:[#allocation7 + $0x198] sm:$0xff]  ;;  %v1947_v22 = vld [vmem:[#allocation7 + $0x128] sm:$0xff]  ;;  %v1950_v23 = vld [vmem:[#allocation7 + $0x190] sm:$0xff] }
  0x51   : > { %326 = vmatprep.subr.mxu0 %v1910_v9  ;;  %393 = vmatprep.subr.mxu1 %v1928_v15  ;;  %v1953_v24 = vld [vmem:[#allocation7 + $0x120] sm:$0xff]  ;;  %v1956_v25 = vld [vmem:[#allocation7 + $0x178] sm:$0xff]  ;;  %v1959_v26 = vld [vmem:[#allocation7 + $0x108] sm:$0xff]  ;;  %p1638_p12 = pnand %p1637_p1, %p1842_p13 }
  0x52   : > { %327 = vmatpush1.msra.mxu0 %v1914_v10  ;;  %394 = vmatpush1.msra.mxu1 %v1930_v16  ;;  %v1962_v27 = vld [vmem:[#allocation7 + $0x170] sm:$0xff]  ;;  %v1965_v28 = vld [vmem:[#allocation7 + $0x100] sm:$0xff]  ;;  %v1968_v29 = vld [vmem:[#allocation7 + $0x158] sm:$0xff] }
  0x53   : > { %328 = vmatprep.subr.mxu0 %v1919_v12  ;;  %395 = vmatprep.subr.mxu1 %v1936_v18  ;;  %v1971_v30 = vld [vmem:[#allocation7 + $0xe8] sm:$0xff]  ;;  %v1974_v31 = vld [vmem:[#allocation7 + $0x150] sm:$0xff]  ;;  %v1977_v32 = vld [vmem:[#allocation7 + $0xe0] sm:$0xff]  ;;  %p1639_p0 = pneg %p1638_p12 }
  0x54   : > { %329 = vmatpush1.msra.mxu0 %v1925_v14  ;;  %396 = vmatpush1.msra.mxu1 %v1942_v20  ;;  %v1980_v33 = vld [vmem:[#allocation7 + $0x138] sm:$0xff]  ;;  %v1983_v34 = vld [vmem:[#allocation7 + $0xc8] sm:$0xff]  ;;  %v1986_v35 = vld [vmem:[#allocation7 + $0x130] sm:$0xff] }
  0x55   : > { %330 = vmatprep.subr.mxu0 %v1933_v17  ;;  %397 = vmatprep.subr.mxu1 %v1944_v21  ;;  %v1989_v36 = vld [vmem:[#allocation7 + $0xc0] sm:$0xff]  ;;  %v1992_v37 = vld [vmem:[#allocation7 + $0x118] sm:$0xff]  ;;  %v1995_v38 = vld [vmem:[#allocation7 + $0xa8] sm:$0xff] }
  0x56   : > { %331 = vmatpush1.msra.mxu0 %v1939_v19  ;;  %398 = vmatpush1.msra.mxu1 %v1950_v23  ;;  %v1998_v39 = vld [vmem:[#allocation7 + $0x110] sm:$0xff]  ;;  %v2001_v40 = vld [vmem:[#allocation7 + $0xa0] sm:$0xff]  ;;  %v2004_v41 = vld [vmem:[#allocation7 + $0xf8] sm:$0xff] }
  0x57   : > { %332 = vmatprep.subr.mxu0 %v1947_v22  ;;  %399 = vmatprep.subr.mxu1 %v1956_v25  ;;  %v2007_v42 = vld [vmem:[#allocation7 + $0x88] sm:$0xff]  ;;  %v2010_v43 = vld [vmem:[#allocation7 + $0xf0] sm:$0xff]  ;;  %v2013_v44 = vld [vmem:[#allocation7 + $0x80] sm:$0xff] }
  0x58   : > { %333 = vmatpush1.msra.mxu0 %v1953_v24  ;;  %400 = vmatpush1.msra.mxu1 %v1962_v27  ;;  %2417 = vst [vmem:[#allocation14_spill] sm:$0xff] %v2013_v44  ;;  %v2016_v45 = vld [vmem:[#allocation7 + $0xd8] sm:$0xff]  ;;  %v2019_v46 = vld [vmem:[#allocation7 + $0x68] sm:$0xff]  ;;  %v2022_v47 = vld [vmem:[#allocation7 + $0xd0] sm:$0xff] }
  0x59   : > { %334 = vmatprep.subr.mxu0 %v1959_v26  ;;  %401 = vmatprep.subr.mxu1 %v1968_v29  ;;  %2418 = vst [vmem:[#allocation15_spill] sm:$0xff] %v2019_v46  ;;  %v2028_v48 = vld [vmem:[#allocation7 + $0x60] sm:$0xff]  ;;  %v2031_v49 = vld [vmem:[#allocation7 + $0xb8] sm:$0xff]  ;;  %v2034_v50 = vld [vmem:[#allocation7 + $0x48] sm:$0xff] }
  0x5a   : > { %335 = vmatpush1.msra.mxu0 %v1965_v28  ;;  %402 = vmatpush1.msra.mxu1 %v1974_v31  ;;  %2419 = vst [vmem:[#allocation16_spill] sm:$0xff] %v2028_v48  ;;  %2420 = vst [vmem:[#allocation17_spill] sm:$0xff] %v2034_v50  ;;  %v2037_v51 = vld [vmem:[#allocation7 + $0xb0] sm:$0xff]  ;;  %v2040_v52 = vld [vmem:[#allocation7 + $0x40] sm:$0xff] }
  0x5b   : > { %336 = vmatprep.subr.mxu0 %v1971_v30  ;;  %403 = vmatprep.subr.mxu1 %v1980_v33  ;;  %2421 = vst [vmem:[#allocation18_spill] sm:$0xff] %v2040_v52  ;;  %v2043_v53 = vld [vmem:[#allocation7 + $0x98] sm:$0xff]  ;;  %v2048_v54 = vld [vmem:[%s2364_s1] sm:$0xff]  ;;  %v2052_v56 = vld [vmem:[#allocation7 + $0x28] sm:$0xff] }
  0x5c   : > { %337 = vmatpush1.msra.mxu0 %v1977_v32  ;;  %404 = vmatpush1.msra.mxu1 %v1986_v35  ;;  %2422 = vst [vmem:[#allocation19_spill] sm:$0xff] %v2048_v54  ;;  %2423 = vst [vmem:[#allocation20_spill] sm:$0xff] %v2052_v56  ;;  %v2055_v57 = vld [vmem:[#allocation7 + $0x90] sm:$0xff]  ;;  %v2059_v58 = vld [vmem:[#allocation7 + $0x20] sm:$0xff]  ;;  %vm491_vm0 = vcmp.lt.s32.totalorder %v490_v55, %v2048_v54  ;;  %vm742_vm1 = vcmp.lt.s32.totalorder %v741_v0, %v2048_v54 }
  0x5d   : > { %338 = vmatprep.subr.mxu0 %v1983_v34  ;;  %405 = vmatprep.subr.mxu1 %v1992_v37  ;;  %2424 = vst [vmem:[#allocation21_spill] sm:$0xff] %v2055_v57  ;;  %2425 = vst [vmem:[#allocation22_spill] sm:$0xff] %v2059_v58  ;;  %v2062_v59 = vld [vmem:[#allocation7 + $0x78] sm:$0xff]  ;;  %v2065_v60 = vld [vmem:[#allocation7 + $0x8] sm:$0xff] }
  0x5e   : > { %339 = vmatpush1.msra.mxu0 %v1989_v36  ;;  %406 = vmatpush1.msra.mxu1 %v1998_v39  ;;  %2426 = vst [vmem:[#allocation23_spill] sm:$0xff] %v2062_v59  ;;  %2427 = vst [vmem:[#allocation24_spill] sm:$0xff] %v2065_v60  ;;  %v2068_v61 = vld [vmem:[#allocation7 + $0x70] sm:$0xff]  ;;  %v2072_v62 = vld [vmem:[#allocation7] sm:$0xff] }
  0x5f   : > { %340 = vmatprep.subr.mxu0 %v1995_v38  ;;  %407 = vmatprep.subr.mxu1 %v2004_v41  ;;  %2428 = vst [vmem:[#allocation25_spill] sm:$0xff] %v2068_v61  ;;  %2429 = vst [vmem:[#allocation26_spill] sm:$0xff] %v2072_v62  ;;  %v2075_v63 = vld [vmem:[#allocation7 + $0x58] sm:$0xff]  ;;  %v2078_v5 = vld [vmem:[#allocation2] sm:$0xff] }
  0x60   : > { %341 = vmatpush1.msra.mxu0 %v2001_v40  ;;  %408 = vmatpush1.msra.mxu1 %v2010_v43  ;;  %2430 = vst [vmem:[#allocation27_spill] sm:$0xff] %v2075_v63  ;;  %v2081_v8 = vld [vmem:[#allocation7 + $0x50] sm:$0xff]  ;;  %v2085_v55 = vld [vmem:[#allocation7 + $0x38] sm:$0xff] }
  0x61   : > { %342 = vmatprep.subr.mxu0 %v2007_v42  ;;  %409 = vmatprep.subr.mxu1 %v2016_v45  ;;  %2431 = vst [vmem:[#allocation28_spill] sm:$0xff] %v2081_v8  ;;  %2432 = vst [vmem:[#allocation29_spill] sm:$0xff] %v2085_v55 }
  0x62   : > { %343 = vmatpush1.msra.mxu0 %v2013_v44  ;;  %410 = vmatpush1.msra.mxu1 %v2022_v47 }
  0x63   : > { %344 = vmatprep.subr.mxu0 %v2019_v46  ;;  %411 = vmatprep.subr.mxu1 %v2031_v49  ;;  %v2439_v0 = vld [vmem:[#allocation20_spill] sm:$0xff] }
  0x64   : > { %345 = vmatpush1.msra.mxu0 %v2028_v48  ;;  %412 = vmatpush1.msra.mxu1 %v2037_v51 }
  0x65   : > { %346 = vmatprep.subr.mxu0 %v2034_v50  ;;  %413 = vmatprep.subr.mxu1 %v2043_v53  ;;  %v2090_v50 = vld [vmem:[#allocation7 + $0x30] sm:$0xff]  ;;  %v2441_v54 = vld [vmem:[#allocation24_spill] sm:$0xff] }
  0x66   : > { %347 = vmatpush1.msra.mxu0 %v2040_v52  ;;  %414 = vmatpush1.msra.mxu1 %v2055_v57  ;;  %2434 = vst [vmem:[#allocation30_spill] sm:$0xff] %v2090_v50 }
  0x67   : > { %348 = vmatprep.subr.mxu0 %v2052_v56  ;;  %415 = vmatprep.subr.mxu1 %v2062_v59  ;;  %v2433_v56 = vmov 0  }
  0x68   : > { %349 = vmatpush1.msra.mxu0 %v2059_v58  ;;  %416 = vmatpush1.msra.mxu1 %v2068_v61  ;;  %v492_v52 = vsel %vm491_vm0, 1, %v2433_v56  ;;  %v2095_v58 = vld [vmem:[#allocation7 + $0x18] sm:$0xff] }
  0x69   : > { %350 = vmatprep.subr.mxu0 %v2065_v60  ;;  %417 = vmatprep.subr.mxu1 %v2075_v63  ;;  %2435 = vst [vmem:[#allocation31_spill] sm:$0xff] %v2095_v58  ;;  %v2098_v60 = vld [vmem:[#allocation7 + $0x10] sm:$0xff] }
  0x6a   : > { %351 = vmatpush1.msra.mxu0 %v2072_v62  ;;  %418 = vmatpush1.msra.mxu1 %v2081_v8  ;;  %2436 = vst [vmem:[#allocation32_spill] sm:$0xff] %v2098_v60  ;;  %v743_v62 = vsel %vm742_vm1, 1, %v2433_v56  ;;  %v2440_v56 = vld [vmem:[#allocation22_spill] sm:$0xff] }
  0x6b   : > { %385 = vmatmul.mubr.f32.vlgmr.msra.gmra.mxu0 %v2078_v5  ;;  %419 = vmatprep.subr.mxu1 %v2085_v55 }
  0x6c   : > { %494 = vperm.xlu0 %1516, %v492_v52   ;;  %420 = vmatpush1.msra.mxu1 %v2090_v50  ;;  %v2437_v52 = vld [vmem:[#allocation17_spill] sm:$0xff] }
  0x6d   : > { %570 = vmatprep.subr.mxu0 %v1891_v1  ;;  %421 = vmatprep.subr.mxu1 %v2095_v58 }
  0x6e   : > { %571 = vmatpush1.msra.mxu0 %v1893_v2  ;;  %422 = vmatpush1.msra.mxu1 %v2098_v60 }
  0x6f   : > { %572 = vmatprep.subr.mxu0 %v1895_v3  ;;  %456 = vmatmul.mubr.f32.vlgmr.msra.gmra.mxu1 %v2078_v5 }
  0x70   : > { %745 = vperm.xlu0 %1516, %v743_v62   ;;  %641 = vmatprep.subr.mxu1 %v1916_v11  ;;  %v2438_v62 = vld [vmem:[#allocation18_spill] sm:$0xff] }
  0x71   : > { %573 = vmatpush1.msra.mxu0 %v1898_v4  ;;  %642 = vmatpush1.msra.mxu1 %v1922_v13 }
  0x72   : > { %574 = vmatprep.subr.mxu0 %v1902_v6  ;;  %643 = vmatprep.subr.mxu1 %v1928_v15 }
  0x73   : > { %575 = vmatpush1.msra.mxu0 %v1906_v7  ;;  %644 = vmatpush1.msra.mxu1 %v1930_v16 }
  0x74   : > { %576 = vmatprep.subr.mxu0 %v1910_v9  ;;  %645 = vmatprep.subr.mxu1 %v1936_v18 }
  0x75   : > { %577 = vmatpush1.msra.mxu0 %v1914_v10  ;;  %646 = vmatpush1.msra.mxu1 %v1942_v20 }
  0x76   : > { %578 = vmatprep.subr.mxu0 %v1919_v12  ;;  %647 = vmatprep.subr.mxu1 %v1944_v21 }
  0x77   : > { %579 = vmatpush1.msra.mxu0 %v1925_v14  ;;  %648 = vmatpush1.msra.mxu1 %v1950_v23 }
  0x78   : > { %580 = vmatprep.subr.mxu0 %v1933_v17  ;;  %649 = vmatprep.subr.mxu1 %v1956_v25 }
  0x79   : > { %581 = vmatpush1.msra.mxu0 %v1939_v19  ;;  %650 = vmatpush1.msra.mxu1 %v1962_v27 }
  0x7a   : > { %582 = vmatprep.subr.mxu0 %v1947_v22  ;;  %651 = vmatprep.subr.mxu1 %v1968_v29 }
  0x7b   : > { %583 = vmatpush1.msra.mxu0 %v1953_v24  ;;  %652 = vmatpush1.msra.mxu1 %v1974_v31 }
  0x7c   : > { %584 = vmatprep.subr.mxu0 %v1959_v26  ;;  %653 = vmatprep.subr.mxu1 %v1980_v33 }
  0x7d   : > { %585 = vmatpush1.msra.mxu0 %v1965_v28  ;;  %654 = vmatpush1.msra.mxu1 %v1986_v35 }
  0x7e   : > { %586 = vmatprep.subr.mxu0 %v1971_v30  ;;  %655 = vmatprep.subr.mxu1 %v1992_v37 }
  0x7f   : > { %587 = vmatpush1.msra.mxu0 %v1977_v32  ;;  %656 = vmatpush1.msra.mxu1 %v1998_v39 }
  0x80   : > { %588 = vmatprep.subr.mxu0 %v1983_v34  ;;  %657 = vmatprep.subr.mxu1 %v2004_v41 }
  0x81   : > { %589 = vmatpush1.msra.mxu0 %v1989_v36  ;;  %658 = vmatpush1.msra.mxu1 %v2010_v43 }
  0x82   : > { %590 = vmatprep.subr.mxu0 %v1995_v38  ;;  %659 = vmatprep.subr.mxu1 %v2016_v45 }
  0x83   : > { %591 = vmatpush1.msra.mxu0 %v2001_v40  ;;  %660 = vmatpush1.msra.mxu1 %v2022_v47 }
  0x84   : > { %592 = vmatprep.subr.mxu0 %v2007_v42  ;;  %661 = vmatprep.subr.mxu1 %v2031_v49 }
  0x85   : > { %593 = vmatpush1.msra.mxu0 %v2013_v44  ;;  %662 = vmatpush1.msra.mxu1 %v2037_v51 }
  0x86   : > { %594 = vmatprep.subr.mxu0 %v2019_v46  ;;  %663 = vmatprep.subr.mxu1 %v2043_v53 }
  0x87   : > { %595 = vmatpush1.msra.mxu0 %v2028_v48  ;;  %664 = vmatpush1.msra.mxu1 %v2055_v57  ;;  %v254_v48 = vld [vmem:[%s1877_s27 + $0x10] sm:$0xff] }
  0x88   : > { %596 = vmatprep.subr.mxu0 %v2437_v52  ;;  %665 = vmatprep.subr.mxu1 %v2062_v59  ;;  %v2442_v52 = vld [vmem:[#allocation26_spill] sm:$0xff] }
  0x89   : > { %597 = vmatpush1.msra.mxu0 %v2438_v62  ;;  %666 = vmatpush1.msra.mxu1 %v2068_v61  ;;  %v2443_v62 = vmov 0.0   ;;  %v255_v61 = vld [vmem:[%s1877_s27 + $0x18] sm:$0xff] }
  0x8a   : > { %598 = vmatprep.subr.mxu0 %v2439_v0  ;;  %667 = vmatprep.subr.mxu1 %v2075_v63 }
  0x8b   : > { %599 = vmatpush1.msra.mxu0 %v2440_v56  ;;  %668 = vmatpush1.msra.mxu1 %v2081_v8 }
  0x8c   : > { %600 = vmatprep.subr.mxu0 %v2441_v54  ;;  %669 = vmatprep.subr.mxu1 %v2085_v55  ;;  %v252_v54 = vld [vmem:[%s1877_s27] sm:$0xff]  ;;  %v253_v55 = vld [vmem:[%s1877_s27 + $0x8] sm:$0xff] }
  0x8d   : > { %601 = vmatpush1.msra.mxu0 %v2442_v52  ;;  %670 = vmatpush1.msra.mxu1 %v2090_v50 }
  0x8e   : > { %634 = vmatprep.mubr.f32.mxu0 %v2443_v62  ;;  %671 = vmatprep.subr.mxu1 %v2095_v58 }
  0x8f   : > { %705 = vmatprep.mubr.f32.mxu1 %v2443_v62  ;;  %672 = vmatpush1.msra.mxu1 %v2098_v60 }
  0x90   : > { %822 = vmatprep.subr.mxu0 %v1891_v1  ;;  %893 = vmatprep.subr.mxu1 %v1916_v11 }
 0x12b   : > { %v386_v56 = vpop.f32.mrf.mxu0 }
 0x12c   : > { %v462_v52 = vadd.f32 %v386_v56, %v252_v54 }
 0x12d   : > { %v388_v0 = vpop.f32.mrf.mxu0 }
 0x12e   : > { %v1401_v50 = vmul.f32 -1.442695, %v462_v52  ;;  %v463_v8 = vadd.f32 %v388_v0, %v253_v55 }
 0x12f   : > { %v457_v58 = vpop.f32.mrf.mxu1 }
 0x130   : > { %1518 = vpow2.f32 %v1401_v50  ;;  %v1402_v63 = vmul.f32 -1.442695, %v463_v8  ;;  %v464_v59 = vadd.f32 %v457_v58, %v254_v48  ;;  %v251_v8 = vld [vmem:[#allocation3] sm:$0xff] }
 0x131   : > { %v459_v62 = vpop.f32.mrf.mxu1 }
 0x132   : > { %1520 = vpow2.f32 %v1402_v63  ;;  %v465_v60 = vadd.f32 %v459_v62, %v255_v61  ;;  %v495_v63 = vpop.permute.xlu0 %494 }
 0x133   : > { %1522 = vtanh.f32 %v464_v59  ;;  %vm496_vm2 = vcmp.eq.s32.totalorder %v495_v63, 1 }
 0x134   : > { %v1403_v46 = vmul.f32 -1.442695, %v465_v60 }
 0x136   : > { %1524 = vpow2.f32 %v1403_v46 }
 0x13d   : > { %v1519_v1 = vpop.eup %1518 }
 0x13e   : > { %v469_v57 = vadd.f32 1.0, %v1519_v1 }
 0x13f   : > { %v1521_v11 = vpop.eup %1520 }
 0x140   : > { %1526 = vrcp.f32 %v469_v57  ;;  %v475_v54 = vadd.f32 1.0, %v1521_v11  ;;  %v1523_v56 = vpop.eup %1522 }
 0x142   : > { %1528 = vrcp.f32 %v475_v54  ;;  %v1404_v54 = vld [vmem:[%s1877_s27 + $0x20] sm:$0xff] }
 0x143   : > { %v1525_v55 = vpop.eup %1524 }
 0x144   : > { %v482_v0 = vadd.f32 1.0, %v1525_v55  ;;  %v1405_v55 = vld [vmem:[%s1877_s27 + $0x28] sm:$0xff] }
 0x146   : > { %1530 = vrcp.f32 %v482_v0 }
 0x14d   : > { %v1527_v50 = vpop.eup %1526 }
 0x14e   : > { %v486_v61 = vmul.f32 %v1527_v50, %v1523_v56 }
 0x14f   : > { %v1529_v52 = vpop.eup %1528 }
 0x150   : > { %v485_v44 = vmul.f32 %v1529_v52, %v251_v8 }
 0x152   : > { %v487_v48 = vadd.f32 %v486_v61, %v485_v44  ;;  %v2465_v44 = vmov 0  }
 0x153   : > { %v1531_v46 = vpop.eup %1530 }
 0x154   : > { %1532 = vtanh.f32 %v487_v48  ;;  %v2177_v58 = vsel %vm496_vm2, %v487_v48, %v251_v8  ;;  %v1407_v48 = vld [vmem:[%s1877_s27 + $0x38] sm:$0xff] }
 0x161   : > { %v1533_v57 = vpop.eup %1532 }
 0x162   : > { %v489_v11 = vmul.f32 %v1533_v57, %v1531_v46 }
 0x164   : > { %v2180_v59 = vsel %vm496_vm2, %v489_v11, %v2078_v5  ;;  %v499_v60 = vsel %vm496_vm2, %v489_v11, 0.0  ;;  %v2447_v5 = vld [vmem:[#allocation23_spill] sm:$0xff] }
 0x165   : > { %500 = vst [vmem:[%s1888_s30] sm:$0xff] %v499_v60  ;;  %635 = vmatmul.mubr.f32.vlgmr.msra.gmra.mxu0 %v2180_v59  ;;  %706 = vmatmul.mubr.f32.vlgmr.msra.gmra.mxu1 %v2180_v59  ;;  %v1406_v11 = vld [vmem:[%s1877_s27 + $0x30] sm:$0xff] }
 0x166   : > { %823 = vmatpush1.msra.mxu0 %v1893_v2  ;;  %894 = vmatpush1.msra.mxu1 %v1922_v13  ;;  %v2444_v2 = vld [vmem:[#allocation14_spill] sm:$0xff] }
 0x167   : > { %824 = vmatprep.subr.mxu0 %v1895_v3  ;;  %895 = vmatprep.subr.mxu1 %v1928_v15  ;;  %v2445_v3 = vld [vmem:[#allocation21_spill] sm:$0xff] }
 0x168   : > { %825 = vmatpush1.msra.mxu0 %v1898_v4  ;;  %896 = vmatpush1.msra.mxu1 %v1930_v16  ;;  %v2446_v4 = vld [vmem:[#allocation15_spill] sm:$0xff] }
 0x169   : > { %826 = vmatprep.subr.mxu0 %v1902_v6  ;;  %897 = vmatprep.subr.mxu1 %v1936_v18  ;;  %v2448_v6 = vld [vmem:[#allocation16_spill] sm:$0xff] }
 0x16a   : > { %827 = vmatpush1.msra.mxu0 %v1906_v7  ;;  %898 = vmatpush1.msra.mxu1 %v1942_v20  ;;  %v2449_v7 = vld [vmem:[#allocation25_spill] sm:$0xff] }
 0x16b   : > { %828 = vmatprep.subr.mxu0 %v1910_v9  ;;  %899 = vmatprep.subr.mxu1 %v1944_v21  ;;  %v2450_v9 = vld [vmem:[#allocation17_spill] sm:$0xff] }
 0x16c   : > { %829 = vmatpush1.msra.mxu0 %v1914_v10  ;;  %900 = vmatpush1.msra.mxu1 %v1950_v23  ;;  %v2451_v10 = vld [vmem:[#allocation27_spill] sm:$0xff] }
 0x16d   : > { %830 = vmatprep.subr.mxu0 %v1919_v12  ;;  %901 = vmatprep.subr.mxu1 %v1956_v25  ;;  %v2452_v12 = vld [vmem:[#allocation18_spill] sm:$0xff] }
 0x16e   : > { %831 = vmatpush1.msra.mxu0 %v1925_v14  ;;  %902 = vmatpush1.msra.mxu1 %v1962_v27  ;;  %v2453_v14 = vld [vmem:[#allocation28_spill] sm:$0xff] }
 0x16f   : > { %832 = vmatprep.subr.mxu0 %v1933_v17  ;;  %903 = vmatprep.subr.mxu1 %v1968_v29  ;;  %v2454_v17 = vld [vmem:[#allocation20_spill] sm:$0xff] }
 0x170   : > { %833 = vmatpush1.msra.mxu0 %v1939_v19  ;;  %904 = vmatpush1.msra.mxu1 %v1974_v31  ;;  %v2455_v19 = vld [vmem:[#allocation29_spill] sm:$0xff] }
 0x171   : > { %834 = vmatprep.subr.mxu0 %v1947_v22  ;;  %905 = vmatprep.subr.mxu1 %v1980_v33  ;;  %v2456_v22 = vld [vmem:[#allocation22_spill] sm:$0xff] }
 0x172   : > { %835 = vmatpush1.msra.mxu0 %v1953_v24  ;;  %906 = vmatpush1.msra.mxu1 %v1986_v35  ;;  %v2457_v24 = vld [vmem:[#allocation30_spill] sm:$0xff] }
 0x173   : > { %836 = vmatprep.subr.mxu0 %v1959_v26  ;;  %907 = vmatprep.subr.mxu1 %v1992_v37  ;;  %v2458_v26 = vld [vmem:[#allocation24_spill] sm:$0xff] }
 0x174   : > { %837 = vmatpush1.msra.mxu0 %v1965_v28  ;;  %908 = vmatpush1.msra.mxu1 %v1998_v39  ;;  %v2459_v28 = vld [vmem:[#allocation31_spill] sm:$0xff] }
 0x175   : > { %838 = vmatprep.subr.mxu0 %v1971_v30  ;;  %909 = vmatprep.subr.mxu1 %v2004_v41  ;;  %v2460_v30 = vld [vmem:[#allocation26_spill] sm:$0xff] }
 0x176   : > { %839 = vmatpush1.msra.mxu0 %v1977_v32  ;;  %910 = vmatpush1.msra.mxu1 %v2010_v43  ;;  %v2461_v32 = vmov 0.0  }
 0x177   : > { %840 = vmatprep.subr.mxu0 %v1983_v34  ;;  %911 = vmatprep.subr.mxu1 %v2016_v45  ;;  %v2462_v34 = vld [vmem:[#allocation32_spill] sm:$0xff] }
 0x178   : > { %841 = vmatpush1.msra.mxu0 %v1989_v36  ;;  %912 = vmatpush1.msra.mxu1 %v2022_v47  ;;  %v2463_v36 = vld [vmem:[#allocation13_spill] sm:$0xff] }
 0x179   : > { %842 = vmatprep.subr.mxu0 %v1995_v38  ;;  %913 = vmatprep.subr.mxu1 %v2031_v49  ;;  %v993_v38 = vstv %s992_s6 }
 0x17a   : > { %843 = vmatpush1.msra.mxu0 %v2001_v40  ;;  %914 = vmatpush1.msra.mxu1 %v2037_v51  ;;  %v1245_v40 = vstv %s1244_s21 }
 0x17b   : > { %844 = vmatprep.subr.mxu0 %v2007_v42  ;;  %915 = vmatprep.subr.mxu1 %v2043_v53  ;;  %v2464_v42 = vld [vmem:[#allocation19_spill] sm:$0xff] }
 0x17c   : > { %845 = vmatpush1.msra.mxu0 %v2444_v2  ;;  %916 = vmatpush1.msra.mxu1 %v2445_v3  ;;  %vm994_vm3 = vcmp.lt.s32.totalorder %v993_v38, %v2464_v42  ;;  %vm1246_vm4 = vcmp.lt.s32.totalorder %v1245_v40, %v2464_v42  ;;  %v1022_v42 = vld [vmem:[#allocation7 + $0x60] sm:$0xff] }
 0x17d   : > { %846 = vmatprep.subr.mxu0 %v2446_v4  ;;  %917 = vmatprep.subr.mxu1 %v2447_v5  ;;  %v995_v62 = vsel %vm994_vm3, 1, %v2465_v44  ;;  %v1247_v1 = vsel %vm1246_vm4, 1, %v2465_v44  ;;  %v1024_v44 = vld [vmem:[#allocation7 + $0x70] sm:$0xff] }
 0x17e   : > { %847 = vmatpush1.msra.mxu0 %v2448_v6  ;;  %918 = vmatpush1.msra.mxu1 %v2449_v7 }
 0x17f   : > { %848 = vmatprep.subr.mxu0 %v2450_v9  ;;  %919 = vmatprep.subr.mxu1 %v2451_v10 }
 0x180   : > { %849 = vmatpush1.msra.mxu0 %v2452_v12  ;;  %920 = vmatpush1.msra.mxu1 %v2453_v14 }
 0x181   : > { %850 = vmatprep.subr.mxu0 %v2454_v17  ;;  %921 = vmatprep.subr.mxu1 %v2455_v19  ;;  %v746_v19 = vpop.permute.xlu0 %745 }
 0x182   : > { %851 = vmatpush1.msra.mxu0 %v2456_v22  ;;  %922 = vmatpush1.msra.mxu1 %v2457_v24  ;;  %vm747_vm5 = vcmp.eq.s32.totalorder %v746_v19, 1 }
 0x183   : > { %852 = vmatprep.subr.mxu0 %v2458_v26  ;;  %923 = vmatprep.subr.mxu1 %v2459_v28 }
 0x184   : > { %853 = vmatpush1.msra.mxu0 %v2460_v30  ;;  %886 = vmatprep.mubr.f32.mxu0 %v2461_v32 }
 0x185   : > { %924 = vmatpush1.msra.mxu1 %v2462_v34  ;;  %957 = vmatprep.mubr.f32.mxu1 %v2461_v32 }
 0x186   : > { %1145 = vmatprep.subr.mxu1 %v2463_v36  ;;  %997 = vperm.xlu1 %1517, %v995_v62   ;;  %v1019_v62 = vld [vmem:[#allocation7 + $0x48] sm:$0xff] }
 0x18a   : > { %1249 = vperm.xlu1 %1517, %v1247_v1   ;;  %v1021_v1 = vld [vmem:[#allocation7 + $0x58] sm:$0xff] }
 0x225   : > { %v636_v56 = vpop.f32.mrf.mxu0  ;;  %v707_v0 = vpop.f32.mrf.mxu1 }
 0x226   : > { %v712_v50 = vadd.f32 %v1404_v54, %v636_v56  ;;  %v714_v4 = vadd.f32 %v1406_v11, %v707_v0  ;;  %v1018_v54 = vld [vmem:[#allocation7 + $0x40] sm:$0xff]  ;;  %v1020_v56 = vld [vmem:[#allocation7 + $0x50] sm:$0xff]  ;;  %v1013_v0 = vld [vmem:[#allocation7 + $0x18] sm:$0xff] }
 0x227   : > { %v638_v8 = vpop.f32.mrf.mxu0  ;;  %v709_v46 = vpop.f32.mrf.mxu1  ;;  %v1413_v11 = vld [vmem:[%s1877_s27 + $0x48] sm:$0xff] }
 0x228   : > { %v1408_v63 = vmul.f32 -1.442695, %v712_v50  ;;  %v713_v52 = vadd.f32 %v1405_v55, %v638_v8  ;;  %v715_v57 = vadd.f32 %v1407_v48, %v709_v46  ;;  %v1015_v55 = vld [vmem:[#allocation7 + $0x28] sm:$0xff]  ;;  %v1017_v50 = vld [vmem:[#allocation7 + $0x38] sm:$0xff]  ;;  %v1014_v8 = vld [vmem:[#allocation7 + $0x20] sm:$0xff] }
 0x229   : > { %v1012_v48 = vld [vmem:[#allocation7 + $0x10] sm:$0xff]  ;;  %v1412_v46 = vld [vmem:[%s1877_s27 + $0x40] sm:$0xff] }
 0x22a   : > { %1534 = vpow2.f32 %v1408_v63  ;;  %v1409_v61 = vmul.f32 -1.442695, %v713_v52  ;;  %v1410_v60 = vmul.f32 -1.442695, %v715_v57  ;;  %v1016_v63 = vld [vmem:[#allocation7 + $0x30] sm:$0xff]  ;;  %v1011_v52 = vld [vmem:[#allocation7 + $0x8] sm:$0xff] }
 0x22c   : > { %1536 = vpow2.f32 %v1409_v61  ;;  %v1010_v61 = vld [vmem:[#allocation7] sm:$0xff] }
 0x22d   : > { %1538 = vpow2.f32 %v1410_v60 }
 0x237   : > { %v1535_v2 = vpop.eup %1534 }
 0x238   : > { %v719_v5 = vadd.f32 1.0, %v1535_v2 }
 0x239   : > { %v1537_v6 = vpop.eup %1536 }
 0x23a   : > { %1540 = vrcp.f32 %v719_v5  ;;  %v725_v7 = vadd.f32 1.0, %v1537_v6  ;;  %v1539_v9 = vpop.eup %1538 }
 0x23b   : > { %1542 = vtanh.f32 %v714_v4  ;;  %v732_v17 = vadd.f32 1.0, %v1539_v9  ;;  %v1415_v9 = vld [vmem:[%s1877_s27 + $0x58] sm:$0xff] }
 0x23c   : > { %1544 = vrcp.f32 %v725_v7 }
 0x23d   : > { %1546 = vrcp.f32 %v732_v17 }
 0x247   : > { %v1541_v10 = vpop.eup %1540 }
 0x248   : > { %v1543_v12 = vpop.eup %1542 }
 0x249   : > { %v1545_v14 = vpop.eup %1544  ;;  %v736_v22 = vmul.f32 %v1543_v12, %v1541_v10 }
 0x24a   : > { %v735_v24 = vmul.f32 %v1545_v14, %v2177_v58  ;;  %v1547_v30 = vpop.eup %1546  ;;  %v1414_v14 = vld [vmem:[%s1877_s27 + $0x50] sm:$0xff] }
 0x24c   : > { %v737_v26 = vadd.f32 %v736_v22, %v735_v24 }
 0x24e   : > { %1548 = vtanh.f32 %v737_v26  ;;  %v2262_v28 = vsel %vm747_vm5, %v737_v26, %v2177_v58  ;;  %v1027_v58 = vld [vmem:[#allocation7 + $0x88] sm:$0xff] }
 0x25b   : > { %v1549_v34 = vpop.eup %1548 }
 0x25c   : > { %v739_v36 = vmul.f32 %v1549_v34, %v1547_v30 }
 0x25e   : > { %v2265_v38 = vsel %vm747_vm5, %v739_v36, %v2180_v59  ;;  %v750_v40 = vsel %vm747_vm5, %v739_v36, 0.0  ;;  %v1026_v59 = vld [vmem:[#allocation7 + $0x80] sm:$0xff] }
 0x25f   : > { %1411 = vst [vmem:[%s1888_s30 + $0x8] sm:$0xff] %v750_v40  ;;  %887 = vmatmul.mubr.f32.vlgmr.msra.gmra.mxu0 %v2265_v38  ;;  %958 = vmatmul.mubr.f32.vlgmr.msra.gmra.mxu1 %v2265_v38 }
 0x260   : > { %1146 = vmatpush1.msra.mxu1 %v1922_v13  ;;  %1138 = vmatprep.mubr.f32.mxu0 %v2461_v32  ;;  %v1071_v13 = vld [vmem:[#allocation7 + $0x1e8] sm:$0xff] }
 0x261   : > { %1147 = vmatprep.subr.mxu1 %v1928_v15  ;;  %1209 = vmatprep.mubr.f32.mxu1 %v2461_v32  ;;  %v1070_v15 = vld [vmem:[#allocation7 + $0x1e0] sm:$0xff]  ;;  %v1025_v32 = vld [vmem:[#allocation7 + $0x78] sm:$0xff] }
 0x262   : > { %1148 = vmatpush1.msra.mxu1 %v1930_v16  ;;  %v1067_v16 = vld [vmem:[#allocation7 + $0x1c8] sm:$0xff]  ;;  %1074 = vmatprep.subr.mxu0 %v1071_v13  ;;  %v998_v13 = vpop.permute.xlu1 %997 }
 0x263   : > { %1149 = vmatprep.subr.mxu1 %v1936_v18  ;;  %v1066_v18 = vld [vmem:[#allocation7 + $0x1c0] sm:$0xff]  ;;  %1075 = vmatpush1.msra.mxu0 %v1070_v15  ;;  %vm999_vm6 = vcmp.eq.s32.totalorder %v998_v13, 1 }
 0x264   : > { %1150 = vmatpush1.msra.mxu1 %v1942_v20  ;;  %v1063_v20 = vld [vmem:[#allocation7 + $0x1a8] sm:$0xff]  ;;  %1076 = vmatprep.subr.mxu0 %v1067_v16 }
 0x265   : > { %1151 = vmatprep.subr.mxu1 %v1944_v21  ;;  %v1062_v21 = vld [vmem:[#allocation7 + $0x1a0] sm:$0xff]  ;;  %1077 = vmatpush1.msra.mxu0 %v1066_v18 }
 0x266   : > { %1152 = vmatpush1.msra.mxu1 %v1950_v23  ;;  %v1059_v23 = vld [vmem:[#allocation7 + $0x188] sm:$0xff]  ;;  %1078 = vmatprep.subr.mxu0 %v1063_v20 }
 0x267   : > { %1153 = vmatprep.subr.mxu1 %v1956_v25  ;;  %v1058_v25 = vld [vmem:[#allocation7 + $0x180] sm:$0xff]  ;;  %1079 = vmatpush1.msra.mxu0 %v1062_v21 }
 0x268   : > { %1154 = vmatpush1.msra.mxu1 %v1962_v27  ;;  %v1055_v27 = vld [vmem:[#allocation7 + $0x168] sm:$0xff]  ;;  %1080 = vmatprep.subr.mxu0 %v1059_v23 }
 0x269   : > { %1155 = vmatprep.subr.mxu1 %v1968_v29  ;;  %v1054_v29 = vld [vmem:[#allocation7 + $0x160] sm:$0xff]  ;;  %1081 = vmatpush1.msra.mxu0 %v1058_v25 }
 0x26a   : > { %1156 = vmatpush1.msra.mxu1 %v1974_v31  ;;  %v1051_v31 = vld [vmem:[#allocation7 + $0x148] sm:$0xff]  ;;  %1082 = vmatprep.subr.mxu0 %v1055_v27 }
 0x26b   : > { %1157 = vmatprep.subr.mxu1 %v1980_v33  ;;  %v1050_v33 = vld [vmem:[#allocation7 + $0x140] sm:$0xff]  ;;  %1083 = vmatpush1.msra.mxu0 %v1054_v29 }
 0x26c   : > { %1158 = vmatpush1.msra.mxu1 %v1986_v35  ;;  %v1047_v35 = vld [vmem:[#allocation7 + $0x128] sm:$0xff]  ;;  %1084 = vmatprep.subr.mxu0 %v1051_v31 }
 0x26d   : > { %1159 = vmatprep.subr.mxu1 %v1992_v37  ;;  %1085 = vmatpush1.msra.mxu0 %v1050_v33  ;;  %v1046_v37 = vld [vmem:[#allocation7 + $0x120] sm:$0xff] }
 0x26e   : > { %1160 = vmatpush1.msra.mxu1 %v1998_v39  ;;  %1086 = vmatprep.subr.mxu0 %v1047_v35  ;;  %v1043_v39 = vld [vmem:[#allocation7 + $0x108] sm:$0xff]  ;;  %v1420_v35 = vld [vmem:[%s1877_s27 + $0x60] sm:$0xff] }
 0x26f   : > { %1161 = vmatprep.subr.mxu1 %v2004_v41  ;;  %1087 = vmatpush1.msra.mxu0 %v1046_v37  ;;  %v1042_v41 = vld [vmem:[#allocation7 + $0x100] sm:$0xff] }
 0x270   : > { %1162 = vmatpush1.msra.mxu1 %v2010_v43  ;;  %1088 = vmatprep.subr.mxu0 %v1043_v39  ;;  %v1039_v43 = vld [vmem:[#allocation7 + $0xe8] sm:$0xff] }
 0x271   : > { %1163 = vmatprep.subr.mxu1 %v2016_v45  ;;  %1089 = vmatpush1.msra.mxu0 %v1042_v41  ;;  %v1038_v45 = vld [vmem:[#allocation7 + $0xe0] sm:$0xff]  ;;  %v1421_v39 = vld [vmem:[%s1877_s27 + $0x68] sm:$0xff] }
 0x272   : > { %1164 = vmatpush1.msra.mxu1 %v2022_v47  ;;  %1090 = vmatprep.subr.mxu0 %v1039_v43  ;;  %v1035_v47 = vld [vmem:[#allocation7 + $0xc8] sm:$0xff] }
 0x273   : > { %1165 = vmatprep.subr.mxu1 %v2031_v49  ;;  %1091 = vmatpush1.msra.mxu0 %v1038_v45  ;;  %v1034_v49 = vld [vmem:[#allocation7 + $0xc0] sm:$0xff] }
 0x274   : > { %1166 = vmatpush1.msra.mxu1 %v2037_v51  ;;  %1092 = vmatprep.subr.mxu0 %v1035_v47  ;;  %v1031_v51 = vld [vmem:[#allocation7 + $0xa8] sm:$0xff] }
 0x275   : > { %1167 = vmatprep.subr.mxu1 %v2043_v53  ;;  %1093 = vmatpush1.msra.mxu0 %v1034_v49  ;;  %v1030_v53 = vld [vmem:[#allocation7 + $0xa0] sm:$0xff] }
 0x276   : > { %1168 = vmatpush1.msra.mxu1 %v2445_v3  ;;  %1094 = vmatprep.subr.mxu0 %v1031_v51  ;;  %v1023_v3 = vld [vmem:[#allocation7 + $0x68] sm:$0xff]  ;;  %v1423_v51 = vld [vmem:[%s1877_s27 + $0x78] sm:$0xff] }
 0x277   : > { %1095 = vmatpush1.msra.mxu0 %v1030_v53  ;;  %1169 = vmatprep.subr.mxu1 %v1025_v32 }
 0x278   : > { %1096 = vmatprep.subr.mxu0 %v1027_v58  ;;  %1170 = vmatpush1.msra.mxu1 %v1024_v44  ;;  %v1422_v58 = vld [vmem:[%s1877_s27 + $0x70] sm:$0xff]  ;;  %s1640_s27 = sshll.u32 %s1729_s26, 4  ;;  %s1641_s27 = int_to_ptr.vmem [resolvable:$false] %s1640_s27 }
 0x279   : > { %1097 = vmatpush1.msra.mxu0 %v1026_v59  ;;  %1171 = vmatprep.subr.mxu1 %v1021_v1  ;;  %s1642_s24 = scalar_lea.vmem %s1641_s27, 1024  ;;  %p1643_p2 = scmp.lt.s32.totalorder %s2314_s7, %s1641_s27 }
 0x27a   : > { %1098 = vmatprep.subr.mxu0 %v1023_v3  ;;  %1172 = vmatpush1.msra.mxu1 %v1020_v56  ;;  %p1644_p3 = scmp.lt.s32.totalorder %s1642_s24, %s1636_s15 }
 0x27b   : > { %1099 = vmatpush1.msra.mxu0 %v1022_v42  ;;  %1173 = vmatprep.subr.mxu1 %v1017_v50 }
 0x27c   : > { %1100 = vmatprep.subr.mxu0 %v1019_v62  ;;  %1174 = vmatpush1.msra.mxu1 %v1016_v63  ;;  %p1645_p5 = por %p1644_p3, %p1643_p2 }
 0x27d   : > { %1101 = vmatpush1.msra.mxu0 %v1018_v54  ;;  %1175 = vmatprep.subr.mxu1 %v1013_v0 }
 0x27e   : > { %1102 = vmatprep.subr.mxu0 %v1015_v55  ;;  %1176 = vmatpush1.msra.mxu1 %v1012_v48  ;;  %p1646_p7 = pnand %p1645_p5, %p1639_p0 }
 0x27f   : > { %1103 = vmatpush1.msra.mxu0 %v1014_v8  ;;  %v1250_v8 = vpop.permute.xlu1 %1249 }
 0x280   : > { %1104 = vmatprep.subr.mxu0 %v1011_v52  ;;  %vm1251_vm7 = vcmp.eq.s32.totalorder %v1250_v8, 1 }
 0x281   : > { %1105 = vmatpush1.msra.mxu0 %v1010_v61 }
 0x31f   : > { %v888_v57 = vpop.f32.mrf.mxu0  ;;  %v959_v6 = vpop.f32.mrf.mxu1 }
 0x320   : > { %v964_v60 = vadd.f32 %v1412_v46, %v888_v57  ;;  %v966_v22 = vadd.f32 %v1414_v14, %v959_v6 }
 0x321   : > { %v890_v2 = vpop.f32.mrf.mxu0  ;;  %v961_v10 = vpop.f32.mrf.mxu1 }
 0x322   : > { %v1416_v4 = vmul.f32 -1.442695, %v964_v60  ;;  %v965_v5 = vadd.f32 %v1413_v11, %v890_v2  ;;  %v967_v12 = vadd.f32 %v1415_v9, %v961_v10 }
 0x324   : > { %1550 = vpow2.f32 %v1416_v4  ;;  %v1417_v7 = vmul.f32 -1.442695, %v965_v5  ;;  %v1418_v17 = vmul.f32 -1.442695, %v967_v12 }
 0x326   : > { %1552 = vpow2.f32 %v1417_v7 }
 0x327   : > { %1554 = vpow2.f32 %v1418_v17 }
 0x331   : > { %v1551_v19 = vpop.eup %1550 }
 0x332   : > { %v971_v24 = vadd.f32 1.0, %v1551_v19 }
 0x333   : > { %v1553_v26 = vpop.eup %1552 }
 0x334   : > { %1556 = vrcp.f32 %v971_v24  ;;  %v977_v30 = vadd.f32 1.0, %v1553_v26  ;;  %v1555_v34 = vpop.eup %1554 }
 0x335   : > { %1558 = vtanh.f32 %v966_v22  ;;  %v984_v16 = vadd.f32 1.0, %v1555_v34 }
 0x336   : > { %1560 = vrcp.f32 %v977_v30 }
 0x337   : > { %1562 = vrcp.f32 %v984_v16 }
 0x341   : > { %v1557_v36 = vpop.eup %1556 }
 0x342   : > { %v1559_v40 = vpop.eup %1558 }
 0x343   : > { %v1561_v15 = vpop.eup %1560  ;;  %v988_v20 = vmul.f32 %v1559_v40, %v1557_v36 }
 0x344   : > { %v987_v18 = vmul.f32 %v1561_v15, %v2262_v28  ;;  %v1563_v25 = vpop.eup %1562 }
 0x346   : > { %v989_v21 = vadd.f32 %v988_v20, %v987_v18 }
 0x348   : > { %1564 = vtanh.f32 %v989_v21  ;;  %v1001_v23 = vsel %vm999_vm6, %v989_v21, %v2262_v28 }
 0x355   : > { %v1565_v27 = vpop.eup %1564 }
 0x356   : > { %v991_v29 = vmul.f32 %v1565_v27, %v1563_v25 }
 0x358   : > { %v1000_v31 = vsel %vm999_vm6, %v991_v29, %v2265_v38  ;;  %v1002_v33 = vsel %vm999_vm6, %v991_v29, 0.0 }
 0x359   : > { %1419 = vst [vmem:[%s1888_s30 + $0x10] sm:$0xff] %v1002_v33  ;;  %1139 = vmatmul.mubr.f32.vlgmr.msra.gmra.mxu0 %v1000_v31  ;;  %1210 = vmatmul.mubr.f32.vlgmr.msra.gmra.mxu1 %v1000_v31 }
 0x419   : > { %v1140_v37 = vpop.f32.mrf.mxu0  ;;  %v1211_v28 = vpop.f32.mrf.mxu1 }
 0x41a   : > { %v1216_v41 = vadd.f32 %v1420_v35, %v1140_v37  ;;  %v1218_v32 = vadd.f32 %v1422_v58, %v1211_v28 }
 0x41b   : > { %v1142_v43 = vpop.f32.mrf.mxu0  ;;  %v1213_v53 = vpop.f32.mrf.mxu1 }
 0x41c   : > { %v1424_v45 = vmul.f32 -1.442695, %v1216_v41  ;;  %v1217_v47 = vadd.f32 %v1421_v39, %v1142_v43  ;;  %v1219_v38 = vadd.f32 %v1423_v51, %v1213_v53 }
 0x41e   : > { %1566 = vpow2.f32 %v1424_v45  ;;  %v1425_v49 = vmul.f32 -1.442695, %v1217_v47  ;;  %v1426_v59 = vmul.f32 -1.442695, %v1219_v38 }
 0x420   : > { %1568 = vpow2.f32 %v1425_v49 }
 0x421   : > { %1570 = vpow2.f32 %v1426_v59 }
 0x42b   : > { %v1567_v3 = vpop.eup %1566 }
 0x42c   : > { %v1223_v42 = vadd.f32 1.0, %v1567_v3 }
 0x42d   : > { %v1569_v44 = vpop.eup %1568 }
 0x42e   : > { %1572 = vrcp.f32 %v1223_v42  ;;  %v1229_v62 = vadd.f32 1.0, %v1569_v44  ;;  %v1571_v1 = vpop.eup %1570 }
 0x42f   : > { %1574 = vtanh.f32 %v1218_v32  ;;  %v1236_v50 = vadd.f32 1.0, %v1571_v1 }
 0x430   : > { %1576 = vrcp.f32 %v1229_v62 }
 0x431   : > { %1578 = vrcp.f32 %v1236_v50 }
 0x43b   : > { %v1573_v54 = vpop.eup %1572 }
 0x43c   : > { %v1575_v56 = vpop.eup %1574 }
 0x43d   : > { %v1577_v55 = vpop.eup %1576  ;;  %v1240_v63 = vmul.f32 %v1575_v56, %v1573_v54 }
 0x43e   : > { %v1239_v52 = vmul.f32 %v1577_v55, %v1001_v23  ;;  %v1579_v48 = vpop.eup %1578 }
 0x440   : > { %v1241_v0 = vadd.f32 %v1240_v63, %v1239_v52 }
 0x442   : > { %1580 = vtanh.f32 %v1241_v0  ;;  %v1253_v61 = vsel %vm1251_vm7, %v1241_v0, %v1001_v23 }
 0x443   : > { %1258 = vst [vmem:[#allocation3] sm:$0xff] %v1253_v61 }
 0x44f   : > { %v1581_v46 = vpop.eup %1580 }
 0x450   : > { %v1243_v57 = vmul.f32 %v1581_v46, %v1579_v48 }
 0x452   : > { %v1252_v11 = vsel %vm1251_vm7, %v1243_v57, %v1000_v31  ;;  %v1254_v60 = vsel %vm1251_vm7, %v1243_v57, 0.0 }
 0x453   : > { %1257 = vst [vmem:[#allocation2] sm:$0xff] %v1252_v11  ;;  %1427 = vst [vmem:[%s1888_s30 + $0x18] sm:$0xff] %v1254_v60 }
 0x454   : > { %1649 = shalt.err (!%p1646_p7)
}
 0x455   : > { %s1650_s30 = scalar_lea.hbm %s2312_s18, 512  ;;  %s1654_s29 = scalar_lea.hbm %s2366_s3, 1024 }
 0x456   : > { %p1651_p4 = scmp.ne.s32.totalorder %s2312_s18, %s1650_s30  ;;  %p1655_p11 = scmp.lt.s32.totalorder %s2312_s18, %s2366_s3 }
 0x457   : > { %p1656_p10 = scmp.lt.s32.totalorder %s1654_s29, %s1650_s30 }
 0x458   : > { %p1652_p6 = pnand %p1651_p4, %p1842_p13 }
 0x459   : > { %p1657_p8 = por %p1656_p10, %p1655_p11 }
 0x45a   : > { %p1653_p9 = pneg %p1652_p6 }
 0x45c   : > { %p1658_p1 = pnand %p1657_p8, %p1653_p9 }
 0x45e   : > { %1661 = shalt.err (!%p1658_p1)
}
 0x45f   : > { %s1730_s21 = smov 128   ;;  %s1731_s10 = smov 8  }
 0x460   : > { %1442 = dma.vmem_to_hbm [thread:$0]  (%p1842_p13), %s2314_s7, 512, %s2312_s18, %s1260_s4, %s1730_s21, %s1730_s21, %s1731_s10  }
 0x461 PF: > { %s1289_s25 = sand.u32 1, %s1700_s12   ;;  %p2466_p12 = scmp.ne.s32.totalorder %s2407_s23, 0 }
 0x462   : > { %p2467_p0 = scmp.ge.s32.totalorder %s1720_s17, 2  ;;  %s1290_s8 = scalar_lea.sflag [#allocation6], %s1289_s25 }
 0x464   : > { %p1453_p2 = pnand %p2467_p0, %p2466_p12 }
 0x466   : > { %p1454_p3 = pneg %p1453_p2 }
 0x468   : > { %1695 = dma.done.wait (%p1454_p3), %s1290_s8, 512  }
 0x469   : > { %1697 = vsyncadd (%p1454_p3), %s1290_s8, 4294966784  ;;  %s20_s17 = sadd.s32 1, %s1720_s17   ;;  %s2468_s12 = smov %s1704_s13 }
 0x46a   : > { %p17_p5 = scmp.ge.s32.totalorder %s20_s17, 4   ;;  %s2469_s13 = smov %s1708_s14 }
 0x46b   : > { %s2470_s14 = smov %s1851_s19  ;;  %s2471_s15 = smov %s1716_s16 }
 0x46c   : > { %s2472_s16 = smov %s2474_s28  ;;  %19 = sbr.rel (!%p17_p5) target bundleno = 7 (0x7), region = 94 }
 0x471   :  { %1295 = vsyncpa [#allocation5], 1 }
 0x472   :  { %1297 = vsyncpa [#allocation5 + $0x1], 1 }
 0x473   :  { %1298 = vsyncpa [#allocation8], 1 }
 0x474   :  { %1299 = vsyncpa [#allocation6], 1 }
 0x475   :  { %1301 = vsyncpa [#allocation6 + $0x1], 1 }

</bundles_post_ra>
